<compile_context>
chip_gen: v5e
topology: v5e:2x2
jax: 0.10.0
libtpu: 0.0.40
codegen_flags: <defaults>
</compile_context>

<pallas_src>
import functools

import numpy as np
import jax
import jax.numpy as jnp
from jax.experimental import pallas as pl
from jax.experimental.pallas import tpu as pltpu

# ----- module sizes (PyTorch module defaults) -----
EMB_SIZE = 128           # emb_size per PositionalEmbedding
HIDDEN = 128             # hidden_size
HIDDEN_LAYERS = 3        # residual Blocks
CONCAT = 3 * EMB_SIZE    # 384  (lane-dense: 3 * 128)
OUT = 2
INPUT_SCALE = 25.0       # input_mlp1 / input_mlp2 scale
TIME_SCALE = 1.0         # time_mlp scale

O_PAD = 128              # output 2 -> 128 (lane-dense store)
DEFAULT_TB = 1024        # batch tile (sweep 512..2048 if desired)


def _round_up(n, m):
    return ((n + m - 1) // m) * m


def gelu_exact(x):
    # nn.GELU() default (erf-based, not tanh approximation)
    return 0.5 * x * (1.0 + jax.lax.erf(x * (1.0 / np.sqrt(2.0))))


# ---------------- host-side constants ----------------
def make_emb_const():
    """(8, CONCAT) f32 constant.
    Rows 0..2: scaled sinusoidal frequencies for the (x1, x2, t) columns
               (each frequency duplicated for its sin half and cos half).
    Row 3    : phase = pi/2 on cos columns (cos(a) == sin(a + pi/2)), 0 else.
    The kernel then computes the full concat embedding as ONE sin():
        x_cat = sin(x1*row0 + x2*row1 + t*row2 + row3)."""
    half = EMB_SIZE // 2
    log_base = np.float32(np.log(np.float32(10000.0))) / np.float32(half - 1)
    freqs = np.exp(-(log_base * np.arange(half, dtype=np.float32))).astype(np.float32)

    const = np.zeros((8, CONCAT), dtype=np.float32)
    scales = (INPUT_SCALE, INPUT_SCALE, TIME_SCALE)
    for j, s in enumerate(scales):
        base = j * EMB_SIZE
        sf = (np.float32(s) * freqs).astype(np.float32)
        const[j, base:base + half] = sf                       # sin columns
        const[j, base + half:base + EMB_SIZE] = sf            # cos columns
        const[3, base + half:base + EMB_SIZE] = np.float32(np.pi / 2.0)  # phase
    return jnp.asarray(const)


def pad_params(params):
    """Only the last Linear (hidden -> 2) needs padding (2 -> 128 columns)."""
    (w0, b0), blocks, (wo, bo) = params
    wop = jnp.zeros((HIDDEN, O_PAD), jnp.float32).at[:, :OUT].set(wo)
    bop = jnp.zeros((1, O_PAD), jnp.float32).at[:, :OUT].set(bo)
    return (w0, b0), blocks, (wop, bop)


# ---------------- Pallas kernel: embeddings + joint_mlp, fused ----------------
def joint_mlp_kernel(inp_ref, emb_ref,
                     w0_ref, b0_ref,
                     w1_ref, b1_ref,
                     w2_ref, b2_ref,
                     w3_ref, b3_ref,
                     wo_ref, bo_ref,
                     o_ref):
    inp = inp_ref[...]            # (tb, 3): columns [x1, x2, t]
    emb = emb_ref[...]            # (8, CONCAT) constant

    # Sinusoidal embeddings + concat, in-register (VPU + one EUP sin):
    #   ang[:, c]  = x1*F0[c] + x2*F1[c] + t*F2[c] + phase[c]
    #   x_cat      = sin(ang)          (cos columns handled by phase = pi/2)
    ang = (inp[:, 0:1] * emb[0:1, :]
           + inp[:, 1:2] * emb[1:2, :]
           + inp[:, 2:3] * emb[2:3, :]
           + emb[3:4, :])
    x_cat = jnp.sin(ang)                                    # (tb, CONCAT)

    # Linear(concat -> hidden) + GELU
    h = jnp.dot(x_cat, w0_ref[...],
                preferred_element_type=jnp.float32) + b0_ref[...]
    h = gelu_exact(h)

    # 3 residual Blocks: x + GELU(Linear(x))
    for w_ref, b_ref in ((w1_ref, b1_ref), (w2_ref, b2_ref), (w3_ref, b3_ref)):
        ff = jnp.dot(h, w_ref[...],
                     preferred_element_type=jnp.float32) + b_ref[...]
        h = h + gelu_exact(ff)

    # output Linear(hidden -> 2), written lane-dense into a 128-wide block
    o_ref[...] = (jnp.dot(h, wo_ref[...],
                          preferred_element_type=jnp.float32) + bo_ref[...]
                  ).astype(o_ref.dtype)


def joint_mlp_pallas(inp, emb_const, padded_params, *, tb):
    Bp, Cin = inp.shape
    assert Bp % tb == 0
    (w0, b0), ((w1, b1), (w2, b2), (w3, b3)), (wo, bo) = padded_params

    def full_spec(a):
        # whole-array block, resident across the batch grid
        return pl.BlockSpec(a.shape, lambda i: (0, 0))

    return pl.pallas_call(
        joint_mlp_kernel,
        out_shape=jax.ShapeDtypeStruct((Bp, O_PAD), jnp.float32),
        grid_spec=pltpu.PrefetchScalarGridSpec(
            num_scalar_prefetch=0,
            grid=(Bp // tb,),
            in_specs=[
                pl.BlockSpec((tb, Cin), lambda i: (i, 0)),   # raw (x1, x2, t)
                full_spec(emb_const),
                full_spec(w0), full_spec(b0),
                full_spec(w1), full_spec(b1),
                full_spec(w2), full_spec(b2),
                full_spec(w3), full_spec(b3),
                full_spec(wo), full_spec(bo),
            ],
            out_specs=pl.BlockSpec((tb, O_PAD), lambda i: (i, 0)),
        ),
        compiler_params=pltpu.CompilerParams(
            dimension_semantics=("parallel",)),
    )(inp, emb_const, w0, b0, w1, b1, w2, b2, w3, b3, wo, bo)


# ---------------- full forward ----------------
@functools.partial(jax.jit, static_argnames=("tb",))
def mlp_forward(x, t, params, *, tb=DEFAULT_TB):
    """x: [B, 2] float32, t: [B] float32 -> [B, 2] float32."""
    B = x.shape[0]
    tb_eff = min(tb, _round_up(B, 8))          # don't over-pad tiny batches
    Bp = _round_up(B, tb_eff)

    inp = jnp.concatenate(
        [x.astype(jnp.float32), t.astype(jnp.float32)[:, None]], axis=-1)  # (B, 3)
    inp = jnp.pad(inp, ((0, Bp - B), (0, 0)))                              # (Bp, 3)

    out_pad = joint_mlp_pallas(inp, make_emb_const(), pad_params(params),
                               tb=tb_eff)
    return out_pad[:B, :OUT]


# ---------------- pure-JAX reference (matches the PyTorch module) -------
def sinusoidal_embedding(v, size, scale=1.0):
    v = v.astype(jnp.float32) * scale
    half = size // 2
    log_base = jnp.log(10000.0) / (half - 1)
    freqs = jnp.exp(-log_base * jnp.arange(half, dtype=jnp.float32))
    ang = v[:, None] * freqs[None, :]
    return jnp.concatenate([jnp.sin(ang), jnp.cos(ang)], axis=-1)


def mlp_forward_ref(x, t, params):
    x1_emb = sinusoidal_embedding(x[:, 0], EMB_SIZE, scale=INPUT_SCALE)
    x2_emb = sinusoidal_embedding(x[:, 1], EMB_SIZE, scale=INPUT_SCALE)
    t_emb = sinusoidal_embedding(t, EMB_SIZE, scale=TIME_SCALE)
    h = jnp.concatenate([x1_emb, x2_emb, t_emb], axis=-1)
    (w0, b0), blocks, (wo, bo) = params
    h = gelu_exact(h @ w0 + b0)
    for (w, b) in blocks:
        h = h + gelu_exact(h @ w + b)
    return h @ wo + bo


# ---------------- deterministic parameter init --------------------------
def init_linear(key, fan_in, fan_out):
    # PyTorch nn.Linear default: U(-1/sqrt(fan_in), 1/sqrt(fan_in))
    kw, kb = jax.random.split(key)
    bound = 1.0 / jnp.sqrt(float(fan_in))
    w = jax.random.uniform(kw, (fan_in, fan_out), jnp.float32, -bound, bound)
    b = jax.random.uniform(kb, (1, fan_out), jnp.float32, -bound, bound)
    return w, b


def init_params(key):
    keys = jax.random.split(key, 2 + HIDDEN_LAYERS)
    first = init_linear(keys[0], CONCAT, HIDDEN)
    blocks = tuple(init_linear(keys[1 + i], HIDDEN, HIDDEN)
                   for i in range(HIDDEN_LAYERS))
    last = init_linear(keys[1 + HIDDEN_LAYERS], HIDDEN, OUT)
    return first, blocks, last


if __name__ == "__main__":
    key = jax.random.PRNGKey(0)
    kx, kt, kp = jax.random.split(key, 3)
    params = init_params(kp)

    # small demo batch (consistent with the module: points in 2D + timestep)
    B = 8
    x = jax.random.normal(kx, (B, 2), jnp.float32)
    t = jax.random.uniform(kt, (B,), jnp.float32, 0.0, 1.0)
    out = jax.block_until_ready(mlp_forward(x, t, params))
    ref = mlp_forward_ref(x, t, params)
    assert out.shape == (B, 2)
    assert jnp.allclose(out, ref, atol=1e-4, rtol=1e-4), (out, ref)

    # larger, non-tile-aligned batch: exercises padding + multi-step grid
    B2 = 1000
    x2 = jax.random.normal(kx, (B2, 2), jnp.float32)
    t2 = jax.random.uniform(kt, (B2,), jnp.float32, 0.0, 1.0)
    out2 = jax.block_until_ready(mlp_forward(x2, t2, params))
    ref2 = mlp_forward_ref(x2, t2, params)
    assert out2.shape == (B2, 2)
    assert jnp.allclose(out2, ref2, atol=1e-4, rtol=1e-4)

    print("KERNEL_OK")
</pallas_src>

<mosaic_0001>
module attributes {stable_mosaic.version = 11 : i64} {
  func.func @joint_mlp_kernel(%arg0: i32, %arg1: memref<8x3xf32, #tpu.memory_space<vmem>>, %arg2: memref<8x384xf32, #tpu.memory_space<vmem>>, %arg3: memref<384x128xf32, #tpu.memory_space<vmem>>, %arg4: memref<1x128xf32, #tpu.memory_space<vmem>>, %arg5: memref<128x128xf32, #tpu.memory_space<vmem>>, %arg6: memref<1x128xf32, #tpu.memory_space<vmem>>, %arg7: memref<128x128xf32, #tpu.memory_space<vmem>>, %arg8: memref<1x128xf32, #tpu.memory_space<vmem>>, %arg9: memref<128x128xf32, #tpu.memory_space<vmem>>, %arg10: memref<1x128xf32, #tpu.memory_space<vmem>>, %arg11: memref<128x128xf32, #tpu.memory_space<vmem>>, %arg12: memref<1x128xf32, #tpu.memory_space<vmem>>, %arg13: memref<8x128xf32, #tpu.memory_space<vmem>>) attributes {dimension_semantics = [#tpu.dimension_semantics<parallel>], iteration_bounds = array<i64: 1>, scalar_prefetch = 0 : i64, scratch_operands = 0 : i64, tpu.core_type = #tpu.core_type<tc>, window_params = [{transform_indices = @transform_0, window_bounds = array<i64: 8, 3>}, {pipeline_mode = #tpu.pipeline_mode<synchronous>, transform_indices = @transform_1, window_bounds = array<i64: 8, 384>}, {pipeline_mode = #tpu.pipeline_mode<synchronous>, transform_indices = @transform_2, window_bounds = array<i64: 384, 128>}, {pipeline_mode = #tpu.pipeline_mode<synchronous>, transform_indices = @transform_3, window_bounds = array<i64: 1, 128>}, {pipeline_mode = #tpu.pipeline_mode<synchronous>, transform_indices = @transform_4, window_bounds = array<i64: 128, 128>}, {pipeline_mode = #tpu.pipeline_mode<synchronous>, transform_indices = @transform_5, window_bounds = array<i64: 1, 128>}, {pipeline_mode = #tpu.pipeline_mode<synchronous>, transform_indices = @transform_6, window_bounds = array<i64: 128, 128>}, {pipeline_mode = #tpu.pipeline_mode<synchronous>, transform_indices = @transform_7, window_bounds = array<i64: 1, 128>}, {pipeline_mode = #tpu.pipeline_mode<synchronous>, transform_indices = @transform_8, window_bounds = array<i64: 128, 128>}, {pipeline_mode = #tpu.pipeline_mode<synchronous>, transform_indices = @transform_9, window_bounds = array<i64: 1, 128>}, {pipeline_mode = #tpu.pipeline_mode<synchronous>, transform_indices = @transform_10, window_bounds = array<i64: 128, 128>}, {pipeline_mode = #tpu.pipeline_mode<synchronous>, transform_indices = @transform_11, window_bounds = array<i64: 1, 128>}, {transform_indices = @transform_12, window_bounds = array<i64: 8, 128>}]} {
    %c0 = arith.constant 0 : index
    %c0_0 = arith.constant 0 : index
    %0 = vector.load %arg1[%c0, %c0_0] : memref<8x3xf32, #tpu.memory_space<vmem>>, vector<8x3xf32>
    %c0_1 = arith.constant 0 : index
    %c0_2 = arith.constant 0 : index
    %1 = vector.load %arg2[%c0_1, %c0_2] : memref<8x384xf32, #tpu.memory_space<vmem>>, vector<8x384xf32>
    %2 = vector.extract_strided_slice %0 {offsets = [0, 0], sizes = [8, 1], strides = [1, 1]} : vector<8x3xf32> to vector<8x1xf32>
    %3 = vector.extract_strided_slice %1 {offsets = [0, 0], sizes = [1, 384], strides = [1, 1]} : vector<8x384xf32> to vector<1x384xf32>
    %4 = vector.broadcast %2 : vector<8x1xf32> to vector<8x384xf32>
    %5 = vector.broadcast %3 : vector<1x384xf32> to vector<8x384xf32>
    %6 = arith.mulf %4, %5 : vector<8x384xf32>
    %7 = vector.extract_strided_slice %0 {offsets = [0, 1], sizes = [8, 1], strides = [1, 1]} : vector<8x3xf32> to vector<8x1xf32>
    %8 = vector.extract_strided_slice %1 {offsets = [1, 0], sizes = [1, 384], strides = [1, 1]} : vector<8x384xf32> to vector<1x384xf32>
    %9 = vector.broadcast %7 : vector<8x1xf32> to vector<8x384xf32>
    %10 = vector.broadcast %8 : vector<1x384xf32> to vector<8x384xf32>
    %11 = arith.mulf %9, %10 : vector<8x384xf32>
    %12 = arith.addf %6, %11 : vector<8x384xf32>
    %13 = vector.extract_strided_slice %0 {offsets = [0, 2], sizes = [8, 1], strides = [1, 1]} : vector<8x3xf32> to vector<8x1xf32>
    %14 = vector.extract_strided_slice %1 {offsets = [2, 0], sizes = [1, 384], strides = [1, 1]} : vector<8x384xf32> to vector<1x384xf32>
    %15 = vector.broadcast %13 : vector<8x1xf32> to vector<8x384xf32>
    %16 = vector.broadcast %14 : vector<1x384xf32> to vector<8x384xf32>
    %17 = arith.mulf %15, %16 : vector<8x384xf32>
    %18 = arith.addf %12, %17 : vector<8x384xf32>
    %19 = vector.extract_strided_slice %1 {offsets = [3, 0], sizes = [1, 384], strides = [1, 1]} : vector<8x384xf32> to vector<1x384xf32>
    %20 = vector.broadcast %19 : vector<1x384xf32> to vector<8x384xf32>
    %21 = arith.addf %18, %20 : vector<8x384xf32>
    %22 = math.sin %21 : vector<8x384xf32>
    %c0_3 = arith.constant 0 : index
    %c0_4 = arith.constant 0 : index
    %23 = vector.load %arg3[%c0_3, %c0_4] : memref<384x128xf32, #tpu.memory_space<vmem>>, vector<384x128xf32>
    %cst = arith.constant dense<0.000000e+00> : vector<8x128xf32>
    %24 = tpu.matmul %22, %23, %cst {dimension_numbers = #tpu.dot_dimension_numbers<[1], [0], [0], [1], [0, 0, 1, 1], [], []>} : vector<8x384xf32>, vector<384x128xf32>, vector<8x128xf32> -> vector<8x128xf32>
    %c0_5 = arith.constant 0 : index
    %c0_6 = arith.constant 0 : index
    %25 = vector.load %arg4[%c0_5, %c0_6] : memref<1x128xf32, #tpu.memory_space<vmem>>, vector<1x128xf32>
    %26 = vector.broadcast %25 : vector<1x128xf32> to vector<8x128xf32>
    %27 = arith.addf %24, %26 : vector<8x128xf32>
    %cst_7 = arith.constant 5.000000e-01 : f32
    %28 = vector.broadcast %cst_7 : f32 to vector<8x128xf32>
    %29 = arith.mulf %28, %27 : vector<8x128xf32>
    %cst_8 = arith.constant 0.707106769 : f32
    %30 = vector.broadcast %cst_8 : f32 to vector<8x128xf32>
    %31 = arith.mulf %27, %30 : vector<8x128xf32>
    %32 = math.erf %31 : vector<8x128xf32>
    %cst_9 = arith.constant 1.000000e+00 : f32
    %33 = vector.broadcast %cst_9 : f32 to vector<8x128xf32>
    %34 = arith.addf %33, %32 : vector<8x128xf32>
    %35 = arith.mulf %29, %34 : vector<8x128xf32>
    %c0_10 = arith.constant 0 : index
    %c0_11 = arith.constant 0 : index
    %36 = vector.load %arg5[%c0_10, %c0_11] : memref<128x128xf32, #tpu.memory_space<vmem>>, vector<128x128xf32>
    %cst_12 = arith.constant dense<0.000000e+00> : vector<8x128xf32>
    %37 = tpu.matmul %35, %36, %cst_12 {dimension_numbers = #tpu.dot_dimension_numbers<[1], [0], [0], [1], [0, 0, 1, 1], [], []>} : vector<8x128xf32>, vector<128x128xf32>, vector<8x128xf32> -> vector<8x128xf32>
    %c0_13 = arith.constant 0 : index
    %c0_14 = arith.constant 0 : index
    %38 = vector.load %arg6[%c0_13, %c0_14] : memref<1x128xf32, #tpu.memory_space<vmem>>, vector<1x128xf32>
    %39 = vector.broadcast %38 : vector<1x128xf32> to vector<8x128xf32>
    %40 = arith.addf %37, %39 : vector<8x128xf32>
    %cst_15 = arith.constant 5.000000e-01 : f32
    %41 = vector.broadcast %cst_15 : f32 to vector<8x128xf32>
    %42 = arith.mulf %41, %40 : vector<8x128xf32>
    %cst_16 = arith.constant 0.707106769 : f32
    %43 = vector.broadcast %cst_16 : f32 to vector<8x128xf32>
    %44 = arith.mulf %40, %43 : vector<8x128xf32>
    %45 = math.erf %44 : vector<8x128xf32>
    %cst_17 = arith.constant 1.000000e+00 : f32
    %46 = vector.broadcast %cst_17 : f32 to vector<8x128xf32>
    %47 = arith.addf %46, %45 : vector<8x128xf32>
    %48 = arith.mulf %42, %47 : vector<8x128xf32>
    %49 = arith.addf %35, %48 : vector<8x128xf32>
    %c0_18 = arith.constant 0 : index
    %c0_19 = arith.constant 0 : index
    %50 = vector.load %arg7[%c0_18, %c0_19] : memref<128x128xf32, #tpu.memory_space<vmem>>, vector<128x128xf32>
    %cst_20 = arith.constant dense<0.000000e+00> : vector<8x128xf32>
    %51 = tpu.matmul %49, %50, %cst_20 {dimension_numbers = #tpu.dot_dimension_numbers<[1], [0], [0], [1], [0, 0, 1, 1], [], []>} : vector<8x128xf32>, vector<128x128xf32>, vector<8x128xf32> -> vector<8x128xf32>
    %c0_21 = arith.constant 0 : index
    %c0_22 = arith.constant 0 : index
    %52 = vector.load %arg8[%c0_21, %c0_22] : memref<1x128xf32, #tpu.memory_space<vmem>>, vector<1x128xf32>
    %53 = vector.broadcast %52 : vector<1x128xf32> to vector<8x128xf32>
    %54 = arith.addf %51, %53 : vector<8x128xf32>
    %cst_23 = arith.constant 5.000000e-01 : f32
    %55 = vector.broadcast %cst_23 : f32 to vector<8x128xf32>
    %56 = arith.mulf %55, %54 : vector<8x128xf32>
    %cst_24 = arith.constant 0.707106769 : f32
    %57 = vector.broadcast %cst_24 : f32 to vector<8x128xf32>
    %58 = arith.mulf %54, %57 : vector<8x128xf32>
    %59 = math.erf %58 : vector<8x128xf32>
    %cst_25 = arith.constant 1.000000e+00 : f32
    %60 = vector.broadcast %cst_25 : f32 to vector<8x128xf32>
    %61 = arith.addf %60, %59 : vector<8x128xf32>
    %62 = arith.mulf %56, %61 : vector<8x128xf32>
    %63 = arith.addf %49, %62 : vector<8x128xf32>
    %c0_26 = arith.constant 0 : index
    %c0_27 = arith.constant 0 : index
    %64 = vector.load %arg9[%c0_26, %c0_27] : memref<128x128xf32, #tpu.memory_space<vmem>>, vector<128x128xf32>
    %cst_28 = arith.constant dense<0.000000e+00> : vector<8x128xf32>
    %65 = tpu.matmul %63, %64, %cst_28 {dimension_numbers = #tpu.dot_dimension_numbers<[1], [0], [0], [1], [0, 0, 1, 1], [], []>} : vector<8x128xf32>, vector<128x128xf32>, vector<8x128xf32> -> vector<8x128xf32>
    %c0_29 = arith.constant 0 : index
    %c0_30 = arith.constant 0 : index
    %66 = vector.load %arg10[%c0_29, %c0_30] : memref<1x128xf32, #tpu.memory_space<vmem>>, vector<1x128xf32>
    %67 = vector.broadcast %66 : vector<1x128xf32> to vector<8x128xf32>
    %68 = arith.addf %65, %67 : vector<8x128xf32>
    %cst_31 = arith.constant 5.000000e-01 : f32
    %69 = vector.broadcast %cst_31 : f32 to vector<8x128xf32>
    %70 = arith.mulf %69, %68 : vector<8x128xf32>
    %cst_32 = arith.constant 0.707106769 : f32
    %71 = vector.broadcast %cst_32 : f32 to vector<8x128xf32>
    %72 = arith.mulf %68, %71 : vector<8x128xf32>
    %73 = math.erf %72 : vector<8x128xf32>
    %cst_33 = arith.constant 1.000000e+00 : f32
    %74 = vector.broadcast %cst_33 : f32 to vector<8x128xf32>
    %75 = arith.addf %74, %73 : vector<8x128xf32>
    %76 = arith.mulf %70, %75 : vector<8x128xf32>
    %77 = arith.addf %63, %76 : vector<8x128xf32>
    %c0_34 = arith.constant 0 : index
    %c0_35 = arith.constant 0 : index
    %78 = vector.load %arg11[%c0_34, %c0_35] : memref<128x128xf32, #tpu.memory_space<vmem>>, vector<128x128xf32>
    %cst_36 = arith.constant dense<0.000000e+00> : vector<8x128xf32>
    %79 = tpu.matmul %77, %78, %cst_36 {dimension_numbers = #tpu.dot_dimension_numbers<[1], [0], [0], [1], [0, 0, 1, 1], [], []>} : vector<8x128xf32>, vector<128x128xf32>, vector<8x128xf32> -> vector<8x128xf32>
    %c0_37 = arith.constant 0 : index
    %c0_38 = arith.constant 0 : index
    %80 = vector.load %arg12[%c0_37, %c0_38] : memref<1x128xf32, #tpu.memory_space<vmem>>, vector<1x128xf32>
    %81 = vector.broadcast %80 : vector<1x128xf32> to vector<8x128xf32>
    %82 = arith.addf %79, %81 : vector<8x128xf32>
    %c0_39 = arith.constant 0 : index
    %c0_40 = arith.constant 0 : index
    %83 = vector.load %arg13[%c0_39, %c0_40] : memref<8x128xf32, #tpu.memory_space<vmem>>, vector<8x128xf32>
    tpu.vector_store %arg13[%c0_39, %c0_40], %82 {strides = array<i32>} : memref<8x128xf32, #tpu.memory_space<vmem>>, vector<8x128xf32>,
    return
  }
  func.func @transform_0(%arg0: i32) -> (i32, i32) {
    %c0_i32 = arith.constant 0 : i32
    %c0_i32_0 = arith.constant 0 : i32
    return %arg0, %c0_i32 : i32, i32
  }
  func.func @transform_1(%arg0: i32) -> (i32, i32) {
    %c0_i32 = arith.constant 0 : i32
    %c0_i32_0 = arith.constant 0 : i32
    %c0_i32_1 = arith.constant 0 : i32
    return %c0_i32, %c0_i32_0 : i32, i32
  }
  func.func @transform_2(%arg0: i32) -> (i32, i32) {
    %c0_i32 = arith.constant 0 : i32
    %c0_i32_0 = arith.constant 0 : i32
    %c0_i32_1 = arith.constant 0 : i32
    return %c0_i32, %c0_i32_0 : i32, i32
  }
  func.func @transform_3(%arg0: i32) -> (i32, i32) {
    %c0_i32 = arith.constant 0 : i32
    %c0_i32_0 = arith.constant 0 : i32
    %c0_i32_1 = arith.constant 0 : i32
    return %c0_i32, %c0_i32_0 : i32, i32
  }
  func.func @transform_4(%arg0: i32) -> (i32, i32) {
    %c0_i32 = arith.constant 0 : i32
    %c0_i32_0 = arith.constant 0 : i32
    %c0_i32_1 = arith.constant 0 : i32
    return %c0_i32, %c0_i32_0 : i32, i32
  }
  func.func @transform_5(%arg0: i32) -> (i32, i32) {
    %c0_i32 = arith.constant 0 : i32
    %c0_i32_0 = arith.constant 0 : i32
    %c0_i32_1 = arith.constant 0 : i32
    return %c0_i32, %c0_i32_0 : i32, i32
  }
  func.func @transform_6(%arg0: i32) -> (i32, i32) {
    %c0_i32 = arith.constant 0 : i32
    %c0_i32_0 = arith.constant 0 : i32
    %c0_i32_1 = arith.constant 0 : i32
    return %c0_i32, %c0_i32_0 : i32, i32
  }
  func.func @transform_7(%arg0: i32) -> (i32, i32) {
    %c0_i32 = arith.constant 0 : i32
    %c0_i32_0 = arith.constant 0 : i32
    %c0_i32_1 = arith.constant 0 : i32
    return %c0_i32, %c0_i32_0 : i32, i32
  }
  func.func @transform_8(%arg0: i32) -> (i32, i32) {
    %c0_i32 = arith.constant 0 : i32
    %c0_i32_0 = arith.constant 0 : i32
    %c0_i32_1 = arith.constant 0 : i32
    return %c0_i32, %c0_i32_0 : i32, i32
  }
  func.func @transform_9(%arg0: i32) -> (i32, i32) {
    %c0_i32 = arith.constant 0 : i32
    %c0_i32_0 = arith.constant 0 : i32
    %c0_i32_1 = arith.constant 0 : i32
    return %c0_i32, %c0_i32_0 : i32, i32
  }
  func.func @transform_10(%arg0: i32) -> (i32, i32) {
    %c0_i32 = arith.constant 0 : i32
    %c0_i32_0 = arith.constant 0 : i32
    %c0_i32_1 = arith.constant 0 : i32
    return %c0_i32, %c0_i32_0 : i32, i32
  }
  func.func @transform_11(%arg0: i32) -> (i32, i32) {
    %c0_i32 = arith.constant 0 : i32
    %c0_i32_0 = arith.constant 0 : i32
    %c0_i32_1 = arith.constant 0 : i32
    return %c0_i32, %c0_i32_0 : i32, i32
  }
  func.func @transform_12(%arg0: i32) -> (i32, i32) {
    %c0_i32 = arith.constant 0 : i32
    %c0_i32_0 = arith.constant 0 : i32
    return %arg0, %c0_i32 : i32, i32
  }
}

</mosaic_0001>

<bundles_post_ra>
// kernel: mlp_forward.1
= control target key start
LH: loop header
LB: loop body
LE: loop exit
PB: predicated region body
PF: predicated region fallthrough
CT: control target
= control target key end

     0   :  { %17 = vsyncpa [#allocation3], 0  ;;  %s1094_s24 = smov [#allocation2]   ;;  %s1095_s26 = smov 128   ;;  %s1831_s0 = inlined_call_operand.vmem [shape: f32[8,3], index: 0, kind: input, shape index: {}]   ;;  %s1832_s1 = inlined_call_operand.vmem [shape: f32[8,384], index: 1, kind: input, shape index: {}]   ;;  %s1833_s2 = inlined_call_operand.vmem [shape: f32[384,128], index: 2, kind: input, shape index: {}]   ;;  %s1834_s3 = inlined_call_operand.vmem [shape: f32[1,128], index: 3, kind: input, shape index: {}]   ;;  %s1835_s4 = inlined_call_operand.vmem [shape: f32[128,128], index: 4, kind: input, shape index: {}]   ;;  %s1836_s5 = inlined_call_operand.vmem [shape: f32[1,128], index: 5, kind: input, shape index: {}]   ;;  %s1837_s6 = inlined_call_operand.vmem [shape: f32[128,128], index: 6, kind: input, shape index: {}]   ;;  %s1838_s7 = inlined_call_operand.vmem [shape: f32[1,128], index: 7, kind: input, shape index: {}]   ;;  %s1839_s8 = inlined_call_operand.hbm [shape: f32[128,128], index: 8, kind: input, shape index: {}]   ;;  %s1840_s9 = inlined_call_operand.vmem [shape: f32[1,128], index: 9, kind: input, shape index: {}]   ;;  %s1841_s10 = inlined_call_operand.vmem [shape: f32[128,128], index: 10, kind: input, shape index: {}]   ;;  %s1842_s11 = inlined_call_operand.vmem [shape: f32[1,128], index: 11, kind: input, shape index: {}]   ;;  %s1843_s12 = inlined_call_operand.vmem [shape: f32[8,128], index: 12, kind: output, shape index: {}]  }
   0x1   :  { %s38_s23 = sshll.u32 %s1839_s8, 4  ;;  %s40_s25 = sshll.u32 %s1094_s24, 4  ;;  %s39_s23 = int_to_ptr.hbm [resolvable:$true] %s38_s23  ;;  %s41_s25 = int_to_ptr.vmem [resolvable:$true] %s40_s25 }
   0x2   :  { %s1096_s27 = smov 8  }
   0x3   :  { %46 = dma.hbm_to_vmem [thread:$0]  %s39_s23, 2048, %s41_s25, [#allocation3], %s1095_s26, %s1095_s26, %s1096_s27  }
   0x4   :  { %1092 = dma.done.wait [#allocation3], 2048  }
   0x5   :  { %1093 = vsyncadd [#allocation3], 4294965248  ;;  %v1097_v0 = vmov 0   ;;  %v1098_v1 = vmov 2   ;;  %v57_v2 = vld [vmem:[%s1831_s0] sm:$0xff]  ;;  %v1099_v3 = vmov 1  }
   0x6   :  { %1051 = vset.pattern.permute.xlu0 %v1097_v0  ;;  %1053 = vset.pattern.permute.xlu1 %v1098_v1  ;;  %v1181_v4 = vld [vmem:[%s1832_s1] sm:$0xff]  ;;  %v584_v5 = vld [vmem:[%s1833_s2 + $0x78] sm:$0xff]  ;;  %v583_v9 = vld [vmem:[%s1833_s2 + $0x70] sm:$0xff] }
   0x7   :  { %63 = vperm.xlu0 %1051, %v57_v2   ;;  %86 = vperm.xlu1 %1053, %v57_v2   ;;  %v600_v6 = vld [vmem:[%s1833_s2 + $0xf8] sm:$0xff]  ;;  %v599_v10 = vld [vmem:[%s1833_s2 + $0xf0] sm:$0xff]  ;;  %v1204_v12 = vld [vmem:[%s1832_s1 + $0x8] sm:$0xff]  ;;  %v66_v19 = vperm.slane %v1181_v4, 0  ;;  %v89_v23 = vperm.slane %v1181_v4, 2  ;;  %v76_v28 = vperm.slane %v1181_v4, 1 }
   0x8   :  { %v616_v7 = vld [vmem:[%s1833_s2 + $0x178] sm:$0xff]  ;;  %621 = vmatpush.msra.mxu0 %v584_v5  ;;  %641 = vmatpush.msra.mxu1 %v600_v6  ;;  %v615_v11 = vld [vmem:[%s1833_s2 + $0x170] sm:$0xff]  ;;  %v582_v13 = vld [vmem:[%s1833_s2 + $0x68] sm:$0xff]  ;;  %v67_v20 = vperm.slane %v1204_v12, 0  ;;  %v90_v24 = vperm.slane %v1204_v12, 2  ;;  %v77_v29 = vperm.slane %v1204_v12, 1 }
   0x9   :  { %661 = vmatpush.msra.mxu2 %v616_v7  ;;  %v598_v14 = vld [vmem:[%s1833_s2 + $0xe8] sm:$0xff]  ;;  %v1215_v15 = vld [vmem:[%s1832_s1 + $0x10] sm:$0xff]  ;;  %v581_v17 = vld [vmem:[%s1833_s2 + $0x60] sm:$0xff]  ;;  %v98_v49 = vperm.slane %v1181_v4, 3  ;;  %v99_v50 = vperm.slane %v1204_v12, 3 }
   0xa   :  { %622 = vmatpush.msra.mxu0 %v583_v9  ;;  %642 = vmatpush.msra.mxu1 %v599_v10  ;;  %v614_v16 = vld [vmem:[%s1833_s2 + $0x168] sm:$0xff]  ;;  %v597_v18 = vld [vmem:[%s1833_s2 + $0xe0] sm:$0xff]  ;;  %v68_v22 = vperm.slane %v1215_v15, 0  ;;  %v91_v25 = vperm.slane %v1215_v15, 2  ;;  %v580_v26 = vld [vmem:[%s1833_s2 + $0x58] sm:$0xff]  ;;  %v78_v30 = vperm.slane %v1215_v15, 1 }
   0xb   :  { %662 = vmatpush.msra.mxu2 %v615_v11  ;;  %v613_v21 = vld [vmem:[%s1833_s2 + $0x160] sm:$0xff]  ;;  %v596_v27 = vld [vmem:[%s1833_s2 + $0xd8] sm:$0xff]  ;;  %v579_v33 = vld [vmem:[%s1833_s2 + $0x50] sm:$0xff]  ;;  %v100_v56 = vperm.slane %v1215_v15, 3 }
   0xc   :  { %623 = vmatpush.msra.mxu0 %v582_v13  ;;  %643 = vmatpush.msra.mxu1 %v598_v14  ;;  %v612_v32 = vld [vmem:[%s1833_s2 + $0x158] sm:$0xff]  ;;  %v595_v34 = vld [vmem:[%s1833_s2 + $0xd0] sm:$0xff]  ;;  %v578_v43 = vld [vmem:[%s1833_s2 + $0x48] sm:$0xff] }
   0xd   :  { %663 = vmatpush.msra.mxu2 %v614_v16  ;;  %v611_v37 = vld [vmem:[%s1833_s2 + $0x150] sm:$0xff]  ;;  %v594_v44 = vld [vmem:[%s1833_s2 + $0xc8] sm:$0xff]  ;;  %v577_v51 = vld [vmem:[%s1833_s2 + $0x40] sm:$0xff] }
   0xe   :  { %624 = vmatpush.msra.mxu0 %v581_v17  ;;  %644 = vmatpush.msra.mxu1 %v597_v18  ;;  %v610_v48 = vld [vmem:[%s1833_s2 + $0x148] sm:$0xff]  ;;  %v593_v52 = vld [vmem:[%s1833_s2 + $0xc0] sm:$0xff]  ;;  %v576_v58 = vld [vmem:[%s1833_s2 + $0x38] sm:$0xff] }
   0xf   :  { %1052 = vset.pattern.permute.xlu0 %v1099_v3  ;;  %664 = vmatpush.msra.mxu2 %v613_v21  ;;  %v609_v57 = vld [vmem:[%s1833_s2 + $0x140] sm:$0xff]  ;;  %v592_v59 = vld [vmem:[%s1833_s2 + $0xb8] sm:$0xff]  ;;  %v607_v6 = vld [vmem:[%s1833_s2 + $0x130] sm:$0xff] }
  0x10   :  { %73 = vperm.xlu0 %1052, %v57_v2   ;;  %625 = vmatpush.msra.mxu0 %v580_v26  ;;  %v608_v63 = vld [vmem:[%s1833_s2 + $0x138] sm:$0xff]  ;;  %v591_v2 = vld [vmem:[%s1833_s2 + $0xb0] sm:$0xff]  ;;  %v574_v7 = vld [vmem:[%s1833_s2 + $0x28] sm:$0xff] }
  0x11   :  { %645 = vmatpush.msra.mxu1 %v596_v27  ;;  %665 = vmatpush.msra.mxu2 %v612_v32  ;;  %v606_v12 = vld [vmem:[%s1833_s2 + $0x128] sm:$0xff]  ;;  %v573_v14 = vld [vmem:[%s1833_s2 + $0x20] sm:$0xff]  ;;  %v572_v21 = vld [vmem:[%s1833_s2 + $0x18] sm:$0xff] }
  0x12   :  { %626 = vmatpush.msra.mxu0 %v579_v33  ;;  %v589_v15 = vld [vmem:[%s1833_s2 + $0xa0] sm:$0xff] }
  0x13   :  { %646 = vmatpush.msra.mxu1 %v595_v34  ;;  %666 = vmatpush.msra.mxu2 %v611_v37  ;;  %v603_v34 = vld [vmem:[%s1833_s2 + $0x110] sm:$0xff] }
  0x14   :  { %627 = vmatpush.msra.mxu0 %v578_v43  ;;  %v569_v43 = vld [vmem:[%s1833_s2] sm:$0xff] }
  0x15   :  { %647 = vmatpush.msra.mxu1 %v594_v44  ;;  %667 = vmatpush.msra.mxu2 %v610_v48  ;;  %v585_v44 = vld [vmem:[%s1833_s2 + $0x80] sm:$0xff] }
  0x16   :  { %628 = vmatpush.msra.mxu0 %v577_v51 }
  0x17   :  { %648 = vmatpush.msra.mxu1 %v593_v52  ;;  %668 = vmatpush.msra.mxu2 %v609_v57 }
  0x18   :  { %1054 = vset.pattern.permute.xlu0 %v1098_v1  ;;  %v575_v1 = vld [vmem:[%s1833_s2 + $0x30] sm:$0xff]  ;;  %629 = vmatpush.msra.mxu0 %v576_v58  ;;  %v1102_v58 = vmov 2131351028  }
  0x19   :  { %649 = vmatpush.msra.mxu1 %v592_v59  ;;  %669 = vmatpush.msra.mxu2 %v608_v63 }
  0x1a   :  { %630 = vmatpush.msra.mxu0 %v575_v1  ;;  %v1104_v1 = vmov 920167782  }
  0x1b   :  { %650 = vmatpush.msra.mxu1 %v591_v2  ;;  %670 = vmatpush.msra.mxu2 %v607_v6 }
  0x1c   :  { %631 = vmatpush.msra.mxu0 %v574_v7  ;;  %v1105_v7 = vmov 1326507024  }
  0x1d   :  { %671 = vmatpush.msra.mxu2 %v606_v12 }
  0x1e   :  { %632 = vmatpush.msra.mxu0 %v573_v14 }
  0x20   :  { %633 = vmatpush.msra.mxu0 %v572_v21 }
  0x79   :  { %v64_v8 = vpop.permute.xlu0 %63  ;;  %v87_v31 = vpop.permute.xlu1 %86 }
  0x7a   :  { %v69_v35 = vmul.f32 %v66_v19, %v64_v8  ;;  %v70_v36 = vmul.f32 %v67_v20, %v64_v8  ;;  %v71_v38 = vmul.f32 %v68_v22, %v64_v8  ;;  %v92_v40 = vmul.f32 %v89_v23, %v87_v31  ;;  %v590_v8 = vld [vmem:[%s1833_s2 + $0xa8] sm:$0xff]  ;;  %v605_v20 = vld [vmem:[%s1833_s2 + $0x120] sm:$0xff]  ;;  %v588_v22 = vld [vmem:[%s1833_s2 + $0x98] sm:$0xff] }
  0x7b   :  { %v93_v41 = vmul.f32 %v90_v24, %v87_v31  ;;  %v94_v42 = vmul.f32 %v91_v25, %v87_v31  ;;  %651 = vmatpush.msra.mxu1 %v590_v8  ;;  %672 = vmatpush.msra.mxu2 %v605_v20 }
  0x7d   :  { %652 = vmatpush.msra.mxu1 %v589_v15 }
  0x7f   :  { %653 = vmatpush.msra.mxu1 %v588_v22 }
  0x82   :  { %v74_v39 = vpop.permute.xlu0 %73 }
  0x83   :  { %v79_v45 = vmul.f32 %v76_v28, %v74_v39  ;;  %v80_v46 = vmul.f32 %v77_v29, %v74_v39  ;;  %v81_v47 = vmul.f32 %v78_v30, %v74_v39  ;;  %v604_v28 = vld [vmem:[%s1833_s2 + $0x118] sm:$0xff]  ;;  %v571_v29 = vld [vmem:[%s1833_s2 + $0x10] sm:$0xff]  ;;  %v602_v39 = vld [vmem:[%s1833_s2 + $0x108] sm:$0xff] }
  0x84   :  { %v587_v30 = vld [vmem:[%s1833_s2 + $0x90] sm:$0xff]  ;;  %673 = vmatpush.msra.mxu2 %v604_v28  ;;  %634 = vmatpush.msra.mxu0 %v571_v29 }
  0x85   :  { %v82_v53 = vadd.f32 %v79_v45, %v69_v35  ;;  %v83_v54 = vadd.f32 %v80_v46, %v70_v36  ;;  %v84_v55 = vadd.f32 %v81_v47, %v71_v38  ;;  %v570_v35 = vld [vmem:[%s1833_s2 + $0x8] sm:$0xff]  ;;  %654 = vmatpush.msra.mxu1 %v587_v30  ;;  %v601_v47 = vld [vmem:[%s1833_s2 + $0x100] sm:$0xff] }
  0x86   :  { %v586_v36 = vld [vmem:[%s1833_s2 + $0x88] sm:$0xff]  ;;  %674 = vmatpush.msra.mxu2 %v603_v34  ;;  %635 = vmatpush.msra.mxu0 %v570_v35 }
  0x87   :  { %v95_v60 = vadd.f32 %v92_v40, %v82_v53  ;;  %v96_v61 = vadd.f32 %v93_v41, %v83_v54  ;;  %v97_v62 = vadd.f32 %v94_v42, %v84_v55  ;;  %655 = vmatpush.msra.mxu1 %v586_v36  ;;  %v1100_v53 = vmov 683565275  }
  0x88   :  { %675 = vmatpush.msra.mxu2 %v602_v39  ;;  %636 = vmatpush.msra.mxu0 %v569_v43  ;;  %v1101_v55 = vmov 2475754826  }
  0x89   :  { %v1292_v3 = vadd.f32 %v98_v49, %v95_v60  ;;  %v1294_v4 = vadd.f32 %v99_v50, %v96_v61  ;;  %v1296_v5 = vadd.f32 %v100_v56, %v97_v62  ;;  %656 = vmatpush.msra.mxu1 %v585_v44  ;;  %v1103_v61 = vmov 2102212464  }
  0x8a   :  { %676 = vmatpush.msra.mxu2 %v601_v47 }
  0x8b   :  { %v107_v9 = vand.u32 2139095040, %v1292_v3  ;;  %v262_v10 = vand.u32 2139095040, %v1294_v4  ;;  %v417_v11 = vand.u32 2139095040, %v1296_v5  ;;  %v104_v13 = vand.u32 2147483647, %v1292_v3 }
  0x8c   :  { %v259_v16 = vand.u32 2147483647, %v1294_v4 }
  0x8d   :  { %v108_v17 = vshrl.u32 %v107_v9, 23  ;;  %v263_v18 = vshrl.u32 %v262_v10, 23  ;;  %v418_v19 = vshrl.u32 %v417_v11, 23  ;;  %v111_v23 = vand.u32 8388607, %v104_v13 }
  0x8e   :  { %v266_v24 = vand.u32 8388607, %v259_v16 }
  0x8f   :  { %v1026_v25 = vadd.s32 4294967169, %v108_v17  ;;  %v1029_v26 = vadd.s32 4294967169, %v263_v18  ;;  %v1032_v27 = vadd.s32 4294967169, %v418_v19  ;;  %v112_v31 = vor.u32 8388608, %v111_v23 }
  0x90   :  { %v267_v37 = vor.u32 8388608, %v266_v24 }
  0x91   :  { %v114_v32 = vadd.s32 1, %v1026_v25  ;;  %v269_v33 = vadd.s32 1, %v1029_v26  ;;  %v1352_v38 = vadd.s32 1, %v1032_v27  ;;  %v1357_v40 = vshll.u32 %v112_v31, 8 }
  0x92   :  { %v1374_v50 = vshll.u32 %v267_v37, 8 }
  0x93   :  { %vm115_vm0 = vcmp.gt.s32.totalorder %v114_v32, 0  ;;  %vm270_vm1 = vcmp.gt.s32.totalorder %v269_v33, 0  ;;  %vm425_vm2 = vcmp.gt.s32.totalorder %v1352_v38, 0  ;;  %v1372_v49 = vand.u32 65535, %v1357_v40 }
  0x94   :  { %v116_v41 = vsel %vm115_vm0, %v114_v32, 0  ;;  %v271_v42 = vsel %vm270_vm1, %v269_v33, 0  ;;  %v154_v29 = vshrl.u32 %v1357_v40, 16  ;;  %v1402_v36 = vsel %vm425_vm2, %v1352_v38, 0 }
  0x95   :  { %v118_v45 = vand.u32 31, %v116_v41  ;;  %v1365_v46 = vand.u32 31, %v271_v42  ;;  %v117_v51 = vshrl.u32 %v116_v41, 5  ;;  %v1397_v35 = vshrl.u32 %v271_v42, 5 }
  0x97   :  { %v119_v48 = vsub.s32 32, %v118_v45  ;;  %v1377_v52 = vsub.s32 32, %v1365_v46  ;;  %v121_v54 = vshll.u32 %v1100_v53, %v118_v45  ;;  %v124_v56 = vshll.u32 %v1101_v55, %v118_v45 }
  0x98   :  { %v127_v60 = vshll.u32 %v1102_v58, %v118_v45  ;;  %v130_v63 = vshll.u32 %v1103_v61, %v118_v45  ;;  %v133_v6 = vshll.u32 %v1104_v1, %v118_v45  ;;  %vm136_vm3 = vcmp.lt.s32.totalorder %v117_v51, 1 }
  0x99   :  { %v122_v57 = vshrl.u32 %v1101_v55, %v119_v48  ;;  %v125_v59 = vshrl.u32 %v1102_v58, %v119_v48  ;;  %v128_v62 = vshrl.u32 %v1103_v61, %v119_v48  ;;  %v131_v2 = vshrl.u32 %v1104_v1, %v119_v48 }
  0x9a   :  { %v134_v8 = vshrl.u32 %v1105_v7, %v119_v48  ;;  %v120_v9 = vshrl.u32 %v1100_v53, %v119_v48  ;;  %vm139_vm4 = vcmp.lt.s32.totalorder %v117_v51, 4  ;;  %vm137_vm5 = vcmp.lt.s32.totalorder %v117_v51, 2 }
  0x9b   :  { %v123_v10 = vor.u32 %v122_v57, %v121_v54  ;;  %v126_v11 = vor.u32 %v125_v59, %v124_v56  ;;  %v129_v12 = vor.u32 %v128_v62, %v127_v60  ;;  %v132_v14 = vor.u32 %v131_v2, %v130_v63 }
  0x9c   :  { %v135_v15 = vor.u32 %v134_v8, %v133_v6  ;;  %vm138_vm6 = vcmp.lt.s32.totalorder %v117_v51, 3  ;;  %v277_v26 = vshrl.u32 %v1101_v55, %v1377_v52  ;;  %v276_v30 = vshll.u32 %v1100_v53, %v1365_v46 }
  0x9d   :  { %v141_v17 = vsel %vm139_vm4, %v129_v12, 2102212464  ;;  %v144_v18 = vsel %vm136_vm3, %v123_v10, %v126_v11  ;;  %v148_v19 = vsel %vm136_vm3, %v126_v11, %v129_v12  ;;  %v140_v20 = vsel %vm136_vm3, %v120_v9, %v123_v10 }
  0x9e   :  { %v145_v21 = vsel %vm139_vm4, %v132_v14, 920167782  ;;  %v149_v22 = vsel %vm139_vm4, %v135_v15, 1326507024  ;;  %v142_v23 = vsel %vm138_vm6, %v126_v11, %v141_v17  ;;  %v279_v39 = vshll.u32 %v1101_v55, %v1365_v46 }
  0x9f   :  { %v146_v24 = vsel %vm138_vm6, %v129_v12, %v145_v21  ;;  %v150_v25 = vsel %vm138_vm6, %v132_v14, %v149_v22  ;;  %v1405_v37 = vsel %vm137_vm5, %v140_v20, %v142_v23  ;;  %v1410_v44 = vor.u32 %v277_v26, %v276_v30 }
  0xa0   :  { %v147_v27 = vsel %vm137_vm5, %v144_v18, %v146_v24  ;;  %v151_v28 = vsel %vm137_vm5, %v148_v19, %v150_v25  ;;  %v280_v42 = vshrl.u32 %v1102_v58, %v1377_v52  ;;  %v282_v38 = vshll.u32 %v1102_v58, %v1365_v46 }
  0xa1   :  { %v155_v31 = vand.u32 65535, %v151_v28  ;;  %v156_v32 = vshrl.u32 %v151_v28, 16  ;;  %v177_v33 = vand.u32 65535, %v147_v27  ;;  %v178_v34 = vshrl.u32 %v147_v27, 16 }
  0xa2   :  { %v283_v48 = vshrl.u32 %v1103_v61, %v1377_v52  ;;  %v285_v11 = vshll.u32 %v1103_v61, %v1365_v46  ;;  %v281_v18 = vor.u32 %v280_v42, %v279_v39  ;;  %v288_v25 = vshll.u32 %v1104_v1, %v1365_v46 }
  0xa3   :  { %v158_v41 = vmul.u32 %v156_v32, %v1372_v49  ;;  %v159_v43 = vmul.u32 %v155_v31, %v154_v29  ;;  %v180_v45 = vmul.u32 %v178_v34, %v1372_v49  ;;  %v181_v47 = vmul.u32 %v177_v33, %v154_v29 }
  0xa4   :  { %v157_v51 = vmul.u32 %v155_v31, %v1372_v49  ;;  %v160_v54 = vmul.u32 %v156_v32, %v154_v29  ;;  %v179_v57 = vmul.u32 %v177_v33, %v1372_v49  ;;  %v182_v62 = vmul.u32 %v178_v34, %v154_v29 }
  0xa5   :  { %v161_v56 = vshll.u32 %v158_v41, 16  ;;  %v162_v59 = vshrl.u32 %v158_v41, 16  ;;  %v163_v60 = vshll.u32 %v159_v43, 16  ;;  %v183_v63 = vshll.u32 %v180_v45, 16 }
  0xa6   :  { %v164_v2 = vshrl.u32 %v159_v43, 16  ;;  %v185_v8 = vshll.u32 %v181_v47, 16  ;;  %v286_v49 = vshrl.u32 %v1104_v1, %v1377_v52  ;;  %v284_v21 = vor.u32 %v283_v48, %v282_v38 }
  0xa7   :  { %vm165_vm7 = vc.u32 %v157_v51, %v161_v56  ;;  %v167_v6 = vadd.s32 %v161_v56, %v157_v51  ;;  %vm187_vm8 = vc.u32 %v179_v57, %v183_v63  ;;  %v189_v10 = vadd.s32 %v183_v63, %v179_v57 }
  0xa8   :  { %v166_v9 = vsel %vm165_vm7, 1, %v1097_v0  ;;  %v188_v14 = vsel %vm187_vm8, 1, %v1097_v0  ;;  %v287_v22 = vor.u32 %v286_v49, %v285_v11  ;;  %v184_v23 = vshrl.u32 %v180_v45, 16 }
  0xa9   :  { %v168_v12 = vadd.s32 %v166_v9, %v160_v54  ;;  %vm169_vm9 = vc.u32 %v167_v6, %v163_v60  ;;  %v190_v17 = vadd.s32 %v188_v14, %v182_v62  ;;  %vm191_vm10 = vc.u32 %v189_v10, %v185_v8 }
  0xaa   :  { %v170_v15 = vsel %vm169_vm9, 1, %v1097_v0  ;;  %v192_v20 = vsel %vm191_vm10, 1, %v1097_v0  ;;  %v289_v26 = vshrl.u32 %v1105_v7, %v1377_v52  ;;  %v186_v28 = vshrl.u32 %v181_v47, 16 }
  0xab   :  { %v172_v19 = vadd.s32 %v170_v15, %v168_v12  ;;  %v194_v24 = vadd.s32 %v192_v20, %v190_v17  ;;  %v1433_v29 = vadd.s32 %v189_v10, %v185_v8  ;;  %vm291_vm11 = vcmp.lt.s32.totalorder %v1397_v35, 1 }
  0xac   :  { %v290_v31 = vor.u32 %v289_v26, %v288_v25  ;;  %vm294_vm12 = vcmp.lt.s32.totalorder %v1397_v35, 4  ;;  %v299_v32 = vsel %vm291_vm11, %v1410_v44, %v281_v18  ;;  %vm293_vm13 = vcmp.lt.s32.totalorder %v1397_v35, 3 }
  0xad   :  { %v173_v27 = vadd.s32 %v172_v19, %v162_v59  ;;  %v195_v30 = vadd.s32 %v194_v24, %v184_v23  ;;  %v300_v46 = vsel %vm294_vm12, %v287_v22, 920167782  ;;  %v303_v34 = vsel %vm291_vm11, %v281_v18, %v284_v21 }
  0xae   :  { %vm292_vm14 = vcmp.lt.s32.totalorder %v1397_v35, 2  ;;  %v301_v41 = vsel %vm293_vm13, %v284_v21, %v300_v46  ;;  %v304_v43 = vsel %vm294_vm12, %v290_v31, 1326507024  ;;  %v308_v47 = vand.u32 65535, %v1374_v50 }
  0xaf   :  { %v1440_v33 = vadd.s32 %v173_v27, %v164_v2  ;;  %v196_v39 = vadd.s32 %v195_v30, %v186_v28  ;;  %v302_v42 = vsel %vm292_vm14, %v299_v32, %v301_v41  ;;  %v305_v45 = vsel %vm293_vm13, %v287_v22, %v304_v43 }
  0xb0   :  { %v197_v38 = vmul.u32 %v1357_v40, %v1405_v37  ;;  %v306_v51 = vsel %vm292_vm14, %v303_v34, %v305_v45  ;;  %v332_v54 = vand.u32 65535, %v302_v42  ;;  %v309_v56 = vshrl.u32 %v1374_v50, 16 }
  0xb1   :  { %vm199_vm15 = vc.u32 %v1440_v33, %v1433_v29  ;;  %v200_v48 = vadd.s32 1, %v196_v39  ;;  %v310_v57 = vand.u32 65535, %v306_v51  ;;  %v311_v59 = vshrl.u32 %v306_v51, 16 }
  0xb2   :  { %v333_v60 = vshrl.u32 %v302_v42, 16  ;;  %v275_v63 = vshrl.u32 %v1100_v53, %v1377_v52  ;;  %v296_v6 = vsel %vm294_vm12, %v284_v21, 2102212464  ;;  %v1469_v37 = vand.u32 31, %v1402_v36 }
  0xb3   :  { %v201_v62 = vsel %vm199_vm15, %v200_v48, %v196_v39  ;;  %v313_v8 = vmul.u32 %v311_v59, %v308_v47  ;;  %v314_v40 = vmul.u32 %v310_v57, %v309_v56  ;;  %v336_v10 = vmul.u32 %v332_v54, %v309_v56 }
  0xb4   :  { %v202_v2 = vadd.s32 %v201_v62, %v197_v38  ;;  %v335_v9 = vmul.u32 %v333_v60, %v308_v47  ;;  %v414_v11 = vand.u32 2147483647, %v1296_v5  ;;  %v295_v14 = vsel %vm291_vm11, %v275_v63, %v1410_v44 }
  0xb5   :  { %v312_v49 = vmul.u32 %v310_v57, %v308_v47  ;;  %v316_v52 = vshll.u32 %v313_v8, 16  ;;  %v297_v15 = vsel %vm293_vm13, %v281_v18, %v296_v6  ;;  %v315_v17 = vmul.u32 %v311_v59, %v309_v56 }
  0xb6   :  { %v203_v12 = vadd.s32 536870912, %v202_v2  ;;  %v334_v19 = vmul.u32 %v332_v54, %v308_v47  ;;  %v338_v20 = vshll.u32 %v335_v9, 16  ;;  %v318_v22 = vshll.u32 %v314_v40, 16 }
  0xb7   :  { %vm320_vm0 = vc.u32 %v312_v49, %v316_v52  ;;  %v322_v23 = vadd.s32 %v316_v52, %v312_v49  ;;  %v340_v25 = vshll.u32 %v336_v10, 16  ;;  %v337_v28 = vmul.u32 %v333_v60, %v309_v56 }
  0xb8   :  { %v1477_v21 = vshrl.u32 %v203_v12, 30  ;;  %v321_v24 = vsel %vm320_vm0, 1, %v1097_v0  ;;  %vm342_vm1 = vc.u32 %v334_v19, %v338_v20  ;;  %v344_v26 = vadd.s32 %v338_v20, %v334_v19 }
  0xb9   :  { %v323_v27 = vadd.s32 %v321_v24, %v315_v17  ;;  %vm324_vm2 = vc.u32 %v322_v23, %v318_v22  ;;  %v343_v30 = vsel %vm342_vm1, 1, %v1097_v0  ;;  %v1485_v31 = vand.u32 8388607, %v414_v11 }
  0xba   :  { %v205_v44 = vshll.u32 %v1477_v21, 30  ;;  %v325_v18 = vsel %vm324_vm2, 1, %v1097_v0  ;;  %vm346_vm3 = vc.u32 %v344_v26, %v340_v25  ;;  %v317_v46 = vshrl.u32 %v313_v8, 16 }
  0xbb   :  { %v327_v34 = vadd.s32 %v325_v18, %v323_v27  ;;  %v345_v39 = vadd.s32 %v343_v30, %v337_v28  ;;  %v1488_v41 = vsub.s32 32, %v1469_v37  ;;  %v298_v43 = vsel %vm292_vm14, %v295_v14, %v297_v15 }
  0xbc   :  { %v206_v32 = vsub.s32 %v202_v2, %v205_v44  ;;  %v347_v42 = vsel %vm346_vm3, 1, %v1097_v0  ;;  %v319_v47 = vshrl.u32 %v314_v40, 16  ;;  %v1494_v48 = vshrl.u32 %v1402_v36, 5 }
  0xbd   :  { %v328_v38 = vadd.s32 %v327_v34, %v317_v46  ;;  %v198_v51 = vadd.s32 %v1433_v29, %v1440_v33  ;;  %v339_v54 = vshrl.u32 %v335_v9, 16  ;;  %v349_v56 = vadd.s32 %v347_v42, %v345_v39 }
  0xbe   :  { %vm207_vm4 = vcmp.lt.s32.totalorder %v206_v32, 0  ;;  %v208_v45 = vsub.s32 0, %v206_v32  ;;  %v352_v35 = vmul.u32 %v1374_v50, %v298_v43  ;;  %v422_v60 = vor.u32 8388608, %v1485_v31 }
  0xbf   :  { %v1498_v59 = vadd.s32 %v328_v38, %v319_v47  ;;  %v341_v63 = vshrl.u32 %v336_v10, 16  ;;  %v350_v2 = vadd.s32 %v349_v56, %v339_v54  ;;  %v432_v6 = vshrl.u32 %v1101_v55, %v1488_v41 }
  0xc0   :  { %v209_v57 = vsel %vm207_vm4, %v208_v45, %v206_v32  ;;  %v1504_v36 = vadd.s32 %v344_v26, %v340_v25  ;;  %v431_v29 = vshll.u32 %v1100_v53, %v1469_v37  ;;  %v435_v33 = vshrl.u32 %v1102_v58, %v1488_v41 }
  0xc1   :  { %v210_v62 = vclz %v209_v57  ;;  %v438_v8 = vshrl.u32 %v1103_v61, %v1488_v41  ;;  %v351_v40 = vadd.s32 %v350_v2, %v341_v63  ;;  %v434_v9 = vshll.u32 %v1101_v55, %v1469_v37 }
  0xc2   :  { %v437_v10 = vshll.u32 %v1102_v58, %v1469_v37  ;;  %vm354_vm5 = vc.u32 %v1498_v59, %v1504_v36  ;;  %v440_v12 = vshll.u32 %v1103_v61, %v1469_v37  ;;  %v441_v14 = vshrl.u32 %v1104_v1, %v1488_v41 }
  0xc3   :  { %v1027_v50 = vadd.s32 4294967294, %v210_v62  ;;  %v444_v49 = vshrl.u32 %v1105_v7, %v1488_v41  ;;  %v355_v52 = vadd.s32 1, %v351_v40  ;;  %v1524_v15 = vor.u32 %v432_v6, %v431_v29 }
  0xc4   :  { %v443_v55 = vshll.u32 %v1104_v1, %v1469_v37  ;;  %v1528_v17 = vor.u32 %v435_v33, %v434_v9  ;;  %v1530_v19 = vor.u32 %v438_v8, %v437_v10  ;;  %v442_v20 = vor.u32 %v441_v14, %v440_v12 }
  0xc5   :  { %vm1028_vm6 = vcmp.lt.s32.totalorder %v1027_v50, 0  ;;  %v356_v23 = vsel %vm354_vm5, %v355_v52, %v351_v40  ;;  %vm446_vm7 = vcmp.lt.s32.totalorder %v1494_v48, 1  ;;  %vm448_vm8 = vcmp.lt.s32.totalorder %v1494_v48, 3 }
  0xc6   :  { %v213_v58 = vsel %vm1028_vm6, 0, %v1027_v50  ;;  %v445_v24 = vor.u32 %v444_v49, %v443_v55  ;;  %v357_v25 = vadd.s32 %v356_v23, %v352_v35  ;;  %vm449_vm9 = vcmp.lt.s32.totalorder %v1494_v48, 4 }
  0xc7   :  { %v214_v61 = vsub.s32 32, %v213_v58  ;;  %v218_v22 = vsub.s32 4294967266, %v213_v58  ;;  %v215_v7 = vshll.u32 %v206_v32, %v213_v58  ;;  %v455_v37 = vsel %vm449_vm9, %v442_v20, 920167782 }
  0xc8   :  { %v358_v44 = vadd.s32 536870912, %v357_v25  ;;  %v454_v27 = vsel %vm446_vm7, %v1524_v15, %v1528_v17  ;;  %v456_v28 = vsel %vm448_vm8, %v1530_v19, %v455_v37  ;;  %v458_v18 = vsel %vm446_vm7, %v1528_v17, %v1530_v19 }
  0xc9   :  { %v216_v26 = vshrl.u32 %v198_v51, %v214_v61  ;;  %v219_v1 = vadd.s32 127, %v218_v22  ;;  %v228_v32 = vsub.s32 4, %v1477_v21  ;;  %v459_v46 = vsel %vm449_vm9, %v445_v24, 1326507024 }
  0xca   :  { %v1551_v34 = vshrl.u32 %v358_v44, 30  ;;  %vm447_vm10 = vcmp.lt.s32.totalorder %v1494_v48, 2  ;;  %v460_v39 = vsel %vm448_vm8, %v442_v20, %v459_v46  ;;  %v1556_v43 = vshll.u32 %v422_v60, 8 }
  0xcb   :  { %v217_v30 = vor.u32 %v216_v26, %v215_v7  ;;  %v220_v31 = vshll.u32 %v219_v1, 23  ;;  %v457_v45 = vsel %vm447_vm10, %v454_v27, %v456_v28  ;;  %v461_v47 = vsel %vm447_vm10, %v458_v18, %v460_v39 }
  0xcc   :  { %vm106_vm11 = vcmp.lt.s32.totalorder %v1292_v3, 0  ;;  %v360_v51 = vshll.u32 %v1551_v34, 30  ;;  %v463_v56 = vand.u32 65535, %v1556_v43  ;;  %v465_v57 = vand.u32 65535, %v461_v47 }
  0xcd   :  { %v221_v42 = vor.u32 4788187, %v220_v31  ;;  %v224_v38 = vcvt.s32.f32 %v217_v30  ;;  %v466_v35 = vshrl.u32 %v461_v47, 16  ;;  %v229_v60 = vsel %vm106_vm11, %v228_v32, %v1477_v21 }
  0xce   :  { %v361_v62 = vsub.s32 %v357_v25, %v360_v51  ;;  %v464_v63 = vshrl.u32 %v1556_v43, 16  ;;  %v488_v2 = vshrl.u32 %v457_v45, 16  ;;  %vm1571_vm12 = vcmp.le.f32.partialorder %v104_v13, 0.7853982 }
  0xcf   :  { %v222_v54 = vand.u32 2147483647, %v221_v42  ;;  %v468_v29 = vmul.u32 %v466_v35, %v463_v56  ;;  %v231_v21 = vsel %vm1571_vm12, 0, %v229_v60  ;;  %v467_v9 = vmul.u32 %v465_v57, %v463_v56 }
  0xd0   :  { %vm362_vm13 = vcmp.lt.s32.totalorder %v361_v62, 0  ;;  %v363_v8 = vsub.s32 0, %v361_v62  ;;  %v1575_v50 = vmul.u32 %v465_v57, %v464_v63  ;;  %v487_v49 = vand.u32 65535, %v457_v45 }
  0xd1   :  { %v225_v6 = vmul.f32 %v224_v38, %v222_v54  ;;  %v471_v10 = vshll.u32 %v468_v29, 16  ;;  %v1580_v52 = vmul.u32 %v488_v2, %v463_v56  ;;  %v430_v61 = vshrl.u32 %v1100_v53, %v1488_v41 }
  0xd2   :  { %v364_v12 = vsel %vm362_vm13, %v363_v8, %v361_v62  ;;  %v473_v14 = vshll.u32 %v1575_v50, 16  ;;  %v470_v22 = vmul.u32 %v466_v35, %v464_v63  ;;  %v248_v7 = vadd.s32 3, %v231_v21 }
  0xd3   :  { %v226_v40 = vxor.u32 2147483648, %v225_v6  ;;  %v365_v55 = vclz %v364_v12  ;;  %vm475_vm14 = vc.u32 %v467_v9, %v471_v10  ;;  %v477_v58 = vadd.s32 %v471_v10, %v467_v9 }
  0xd4   :  { %v476_v25 = vsel %vm475_vm14, 1, %v1097_v0  ;;  %v491_v37 = vmul.u32 %v487_v49, %v464_v63  ;;  %v493_v28 = vshll.u32 %v1580_v52, 16  ;;  %v353_v18 = vadd.s32 %v1504_v36, %v1498_v59 }
  0xd5   :  { %v227_v13 = vsel %vm106_vm11, %v226_v40, %v225_v6  ;;  %v1030_v24 = vadd.s32 4294967294, %v365_v55  ;;  %vm479_vm15 = vc.u32 %v477_v58, %v473_v14  ;;  %v478_v26 = vadd.s32 %v476_v25, %v470_v22 }
  0xd6   :  { %v230_v20 = vsel %vm1571_vm12, %v1292_v3, %v227_v13  ;;  %v480_v1 = vsel %vm479_vm15, 1, %v1097_v0  ;;  %v472_v41 = vshrl.u32 %v468_v29, 16  ;;  %v489_v30 = vmul.u32 %v487_v49, %v463_v56 }
  0xd7   :  { %v232_v23 = vmul.f32 %v230_v20, %v230_v20  ;;  %vm1031_vm0 = vcmp.lt.s32.totalorder %v1030_v24, 0  ;;  %v482_v39 = vadd.s32 %v480_v1, %v478_v26  ;;  %v492_v45 = vmul.u32 %v488_v2, %v464_v63 }
  0xd8   :  { %v368_v53 = vsel %vm1031_vm0, 0, %v1030_v24  ;;  %v495_v47 = vshll.u32 %v491_v37, 16  ;;  %vm497_vm1 = vc.u32 %v489_v30, %v493_v28  ;;  %v499_v6 = vadd.s32 %v493_v28, %v489_v30 }
  0xd9   :  { %v233_v44 = vmul.f32 -0.001358992, %v232_v23  ;;  %v240_v27 = vmul.f32 -0.00019511016, %v232_v23  ;;  %v369_v46 = vsub.s32 32, %v368_v53  ;;  %v373_v42 = vsub.s32 4294967266, %v368_v53 }
  0xda   :  { %v498_v57 = vsel %vm497_vm1, 1, %v1097_v0  ;;  %v370_v35 = vshll.u32 %v361_v62, %v368_v53  ;;  %v249_v56 = vand.u32 3, %v248_v7  ;;  %v483_v33 = vadd.s32 %v482_v39, %v472_v41 }
  0xdb   :  { %v234_v31 = vadd.f32 0.041655596, %v233_v44  ;;  %v241_v32 = vadd.f32 0.008332121, %v240_v27  ;;  %v371_v54 = vshrl.u32 %v353_v18, %v369_v46  ;;  %v374_v60 = vadd.s32 127, %v373_v42 }
  0xdc   :  { %v500_v59 = vadd.s32 %v498_v57, %v492_v45  ;;  %v451_v63 = vsel %vm449_vm9, %v1530_v19, 2102212464  ;;  %vm501_vm2 = vc.u32 %v499_v6, %v495_v47  ;;  %v474_v9 = vshrl.u32 %v1575_v50, 16 }
  0xdd   :  { %v235_v38 = vmul.f32 %v234_v31, %v232_v23  ;;  %v242_v51 = vmul.f32 %v241_v32, %v232_v23  ;;  %v372_v8 = vor.u32 %v371_v54, %v370_v35  ;;  %v375_v40 = vshll.u32 %v374_v60, 23 }
  0xde   :  { %v502_v62 = vsel %vm501_vm2, 1, %v1097_v0  ;;  %v450_v12 = vsel %vm446_vm7, %v430_v61, %v1524_v15  ;;  %v494_v14 = vshrl.u32 %v1580_v52, 16  ;;  %v452_v19 = vsel %vm448_vm8, %v1528_v17, %v451_v63 }
  0xdf   :  { %v236_v36 = vadd.f32 -0.4999988, %v235_v38  ;;  %v243_v29 = vadd.f32 -0.16666654, %v242_v51  ;;  %v376_v10 = vor.u32 4788187, %v375_v40  ;;  %v504_v49 = vadd.s32 %v502_v62, %v500_v59 }
  0xe0   :  { %v1607_v58 = vadd.s32 %v483_v33, %v474_v9  ;;  %v379_v50 = vcvt.s32.f32 %v372_v8  ;;  %v503_v7 = vadd.s32 %v499_v6, %v495_v47  ;;  %vm247_vm3 = vweird.f32 %v1292_v3 }
  0xe1   :  { %v237_v2 = vmul.f32 %v236_v36, %v232_v23  ;;  %v244_v21 = vmul.f32 %v243_v29, %v232_v23  ;;  %v377_v22 = vand.u32 2147483647, %v376_v10  ;;  %v496_v23 = vshrl.u32 %v491_v37, 16 }
  0xe2   :  { %v505_v0 = vadd.s32 %v504_v49, %v494_v14  ;;  %v453_v52 = vsel %vm447_vm10, %v450_v12, %v452_v19  ;;  %vm1614_vm4 = vcmp.le.f32.partialorder %v259_v16, 0.7853982  ;;  %vm261_vm5 = vcmp.lt.s32.totalorder %v1294_v4, 0 }
  0xe3   :  { %v238_v13 = vadd.f32 1.0, %v237_v2  ;;  %v245_v55 = vadd.f32 1.0, %v244_v21  ;;  %v380_v15 = vmul.f32 %v379_v50, %v377_v22  ;;  %vm509_vm6 = vc.u32 %v1607_v58, %v503_v7 }
  0xe4   :  { %v506_v61 = vadd.s32 %v505_v0, %v496_v23  ;;  %vm251_vm7 = vcmp.eq.s32.totalorder %v249_v56, 0  ;;  %vm254_vm8 = vcmp.eq.s32.totalorder %v249_v56, 2  ;;  %vm250_vm9 = vcmp.lt.s32.totalorder %v249_v56, 2 }
  0xe5   :  { %v246_v24 = vmul.f32 %v245_v55, %v230_v20  ;;  %v255_v25 = vxor.u32 2147483648, %v238_v13  ;;  %v381_v20 = vxor.u32 2147483648, %v380_v15  ;;  %v507_v44 = vmul.u32 %v1556_v43, %v453_v52 }
  0xe6   :  { %v510_v1 = vadd.s32 1, %v506_v61  ;;  %v383_v28 = vsub.s32 4, %v1551_v34  ;;  %v508_v62 = vadd.s32 %v503_v7, %v1607_v58  ;;  %vm402_vm15 = vweird.f32 %v1294_v4 }
  0xe7   :  { %v252_v26 = vxor.u32 2147483648, %v246_v24  ;;  %v256_v48 = vsel %vm254_vm8, %v255_v25, %v246_v24  ;;  %v382_v16 = vsel %vm261_vm5, %v381_v20, %v380_v15  ;;  %vm416_vm0 = vcmp.lt.s32.totalorder %v1296_v5, 0 }
  0xe8   :  { %v511_v18 = vsel %vm509_vm6, %v510_v1, %v506_v61  ;;  %v385_v41 = vsel %vm1614_vm4, %v1294_v4, %v382_v16  ;;  %v384_v43 = vsel %vm261_vm5, %v383_v28, %v1551_v34  ;;  %vm415_vm1 = vcmp.le.f32.partialorder %v414_v11, 0.7853982 }
  0xe9   :  { %v253_v37 = vsel %vm251_vm7, %v238_v13, %v252_v26  ;;  %v512_v30 = vadd.s32 %v511_v18, %v507_v44  ;;  %v387_v31 = vmul.f32 %v385_v41, %v385_v41  ;;  %v386_v3 = vsel %vm1614_vm4, 0, %v384_v43 }
  0xea   :  { %v257_v27 = vsel %vm250_vm9, %v253_v37, %v256_v48  ;;  %v403_v6 = vadd.s32 3, %v386_v3  ;;  %vm557_vm5 = vweird.f32 %v1296_v5 }
  0xeb   :  { %v258_v53 = vsel %vm247_vm3, nan, %v257_v27  ;;  %v513_v32 = vadd.s32 536870912, %v512_v30  ;;  %v388_v46 = vmul.f32 -0.001358992, %v387_v31  ;;  %v395_v39 = vmul.f32 -0.00019511016, %v387_v31 }
  0xec   :  { %637 = vmatmul.f32.vlgmr.msra.gmra.mxu0 %v258_v53  ;;  %v404_v8 = vand.u32 3, %v403_v6 }
  0xed   :  { %v514_v42 = vshrl.u32 %v513_v32, 30  ;;  %v389_v45 = vadd.f32 0.041655596, %v388_v46  ;;  %v396_v47 = vadd.f32 0.008332121, %v395_v39 }
  0xee   :  { %vm405_vm11 = vcmp.lt.s32.totalorder %v404_v8, 2  ;;  %vm406_vm13 = vcmp.eq.s32.totalorder %v404_v8, 0  ;;  %vm409_vm14 = vcmp.eq.s32.totalorder %v404_v8, 2 }
  0xef   :  { %v515_v38 = vshll.u32 %v514_v42, 30  ;;  %v390_v51 = vmul.f32 %v389_v45, %v387_v31  ;;  %v397_v54 = vmul.f32 %v396_v47, %v387_v31  ;;  %v538_v4 = vsub.s32 4, %v514_v42 }
  0xf1   :  { %v516_v57 = vsub.s32 %v512_v30, %v515_v38  ;;  %v391_v35 = vadd.f32 -0.4999988, %v390_v51  ;;  %v398_v60 = vadd.f32 -0.16666654, %v397_v54  ;;  %v539_v37 = vsel %vm416_vm0, %v538_v4, %v514_v42  ;;  %v1055_v51 = vld [vmem:[%s1834_s3] ss:$0 sm:$0xff] }
  0xf2   :  { %v541_v27 = vsel %vm415_vm1, 0, %v539_v37 }
  0xf3   :  { %vm517_vm10 = vcmp.lt.s32.totalorder %v516_v57, 0  ;;  %v518_v59 = vsub.s32 0, %v516_v57  ;;  %v392_v36 = vmul.f32 %v391_v35, %v387_v31  ;;  %v399_v29 = vmul.f32 %v398_v60, %v387_v31  ;;  %v740_v35 = vld [vmem:[%s1835_s4 + $0x78] sm:$0xff]  ;;  %v739_v60 = vld [vmem:[%s1835_s4 + $0x70] sm:$0xff] }
  0xf4   :  { %745 = vmatpush.msra.mxu3 %v740_v35 }
  0xf5   :  { %v519_v34 = vsel %vm517_vm10, %v518_v59, %v516_v57  ;;  %v393_v56 = vadd.f32 1.0, %v392_v36  ;;  %v400_v33 = vadd.f32 1.0, %v399_v29  ;;  %v738_v59 = vld [vmem:[%s1835_s4 + $0x68] sm:$0xff] }
  0xf6   :  { %v520_v40 = vclz %v519_v34  ;;  %746 = vmatpush.msra.mxu3 %v739_v60  ;;  %v737_v34 = vld [vmem:[%s1835_s4 + $0x60] sm:$0xff] }
  0xf7   :  { %v401_v63 = vmul.f32 %v400_v33, %v385_v41  ;;  %v410_v2 = vxor.u32 2147483648, %v393_v56  ;;  %v558_v41 = vadd.s32 3, %v541_v27  ;;  %v736_v33 = vld [vmem:[%s1835_s4 + $0x58] sm:$0xff] }
  0xf8   :  { %v1033_v21 = vadd.s32 4294967294, %v520_v40  ;;  %747 = vmatpush.msra.mxu3 %v738_v59  ;;  %v735_v40 = vld [vmem:[%s1835_s4 + $0x50] sm:$0xff] }
  0xf9   :  { %v407_v9 = vxor.u32 2147483648, %v401_v63  ;;  %v411_v14 = vsel %vm409_vm14, %v410_v2, %v401_v63  ;;  %v559_v43 = vand.u32 3, %v558_v41  ;;  %v734_v2 = vld [vmem:[%s1835_s4 + $0x48] sm:$0xff] }
  0xfa   :  { %vm1034_vm12 = vcmp.lt.s32.totalorder %v1033_v21, 0  ;;  %748 = vmatpush.msra.mxu3 %v737_v34 }
  0xfb   :  { %v523_v10 = vsel %vm1034_vm12, 0, %v1033_v21  ;;  %v408_v12 = vsel %vm406_vm13, %v393_v56, %v407_v9  ;;  %vm561_vm2 = vcmp.eq.s32.totalorder %v559_v43, 0  ;;  %vm564_vm3 = vcmp.eq.s32.totalorder %v559_v43, 2  ;;  %v733_v9 = vld [vmem:[%s1835_s4 + $0x40] sm:$0xff] }
  0xfc   :  { %v524_v49 = vsub.s32 32, %v523_v10  ;;  %v528_v13 = vsub.s32 4294967266, %v523_v10  ;;  %v412_v55 = vsel %vm405_vm11, %v408_v12, %v411_v14  ;;  %v525_v22 = vshll.u32 %v516_v57, %v523_v10  ;;  %749 = vmatpush.msra.mxu3 %v736_v33  ;;  %v732_v12 = vld [vmem:[%s1835_s4 + $0x38] sm:$0xff] }
  0xfd   :  { %v413_v19 = vsel %vm402_vm15, nan, %v412_v55  ;;  %vm560_vm4 = vcmp.lt.s32.totalorder %v559_v43, 2 }
  0xfe   :  { %v526_v50 = vshrl.u32 %v508_v62, %v524_v49  ;;  %v529_v23 = vadd.s32 127, %v528_v13  ;;  %657 = vmatmul.f32.vlgmr.msra.gmra.mxu1 %v413_v19  ;;  %750 = vmatpush.msra.mxu3 %v735_v40  ;;  %v731_v13 = vld [vmem:[%s1835_s4 + $0x30] sm:$0xff]  ;;  %v730_v19 = vld [vmem:[%s1835_s4 + $0x28] sm:$0xff] }
 0x100   :  { %v527_v0 = vor.u32 %v526_v50, %v525_v22  ;;  %v530_v24 = vshll.u32 %v529_v23, 23  ;;  %751 = vmatpush.msra.mxu3 %v734_v2  ;;  %v729_v23 = vld [vmem:[%s1835_s4 + $0x20] sm:$0xff]  ;;  %v824_v2 = vld [vmem:[%s1837_s6 + $0x70] sm:$0xff] }
 0x102   :  { %v531_v25 = vor.u32 4788187, %v530_v24  ;;  %v534_v52 = vcvt.s32.f32 %v527_v0  ;;  %752 = vmatpush.msra.mxu3 %v733_v9  ;;  %v728_v24 = vld [vmem:[%s1835_s4 + $0x18] sm:$0xff]  ;;  %v823_v9 = vld [vmem:[%s1837_s6 + $0x68] sm:$0xff] }
 0x104   :  { %v532_v15 = vand.u32 2147483647, %v531_v25  ;;  %753 = vmatpush.msra.mxu3 %v732_v12  ;;  %v822_v12 = vld [vmem:[%s1837_s6 + $0x60] sm:$0xff] }
 0x106   :  { %v535_v61 = vmul.f32 %v534_v52, %v532_v15  ;;  %754 = vmatpush.msra.mxu3 %v731_v13  ;;  %v727_v52 = vld [vmem:[%s1835_s4 + $0x10] sm:$0xff] }
 0x108   :  { %v536_v58 = vxor.u32 2147483648, %v535_v61  ;;  %755 = vmatpush.msra.mxu3 %v730_v19  ;;  %v820_v19 = vld [vmem:[%s1837_s6 + $0x50] sm:$0xff] }
 0x10a   :  { %v537_v7 = vsel %vm416_vm0, %v536_v58, %v535_v61  ;;  %756 = vmatpush.msra.mxu3 %v729_v23  ;;  %v726_v58 = vld [vmem:[%s1835_s4 + $0x8] sm:$0xff]  ;;  %v818_v23 = vld [vmem:[%s1837_s6 + $0x40] sm:$0xff] }
 0x10b   :  { %v540_v26 = vsel %vm415_vm1, %v1296_v5, %v537_v7 }
 0x10c   :  { %v542_v17 = vmul.f32 %v540_v26, %v540_v26  ;;  %757 = vmatpush.msra.mxu3 %v728_v24 }
 0x10e   :  { %v543_v20 = vmul.f32 -0.001358992, %v542_v17  ;;  %v550_v1 = vmul.f32 -0.00019511016, %v542_v17  ;;  %758 = vmatpush.msra.mxu3 %v727_v52  ;;  %v816_v52 = vld [vmem:[%s1837_s6 + $0x30] sm:$0xff] }
 0x110   :  { %v544_v48 = vadd.f32 0.041655596, %v543_v20  ;;  %v551_v44 = vadd.f32 0.008332121, %v550_v1  ;;  %759 = vmatpush.msra.mxu3 %v726_v58  ;;  %v815_v58 = vld [vmem:[%s1837_s6 + $0x28] sm:$0xff] }
 0x112   :  { %v545_v16 = vmul.f32 %v544_v48, %v542_v17  ;;  %v552_v28 = vmul.f32 %v551_v44, %v542_v17 }
 0x114   :  { %v546_v18 = vadd.f32 -0.4999988, %v545_v16  ;;  %v553_v53 = vadd.f32 -0.16666654, %v552_v28 }
 0x116   :  { %v547_v30 = vmul.f32 %v546_v18, %v542_v17  ;;  %v554_v31 = vmul.f32 %v553_v53, %v542_v17 }
 0x118   :  { %v548_v32 = vadd.f32 1.0, %v547_v30  ;;  %v555_v11 = vadd.f32 1.0, %v554_v31 }
 0x11a   :  { %v556_v46 = vmul.f32 %v555_v11, %v540_v26  ;;  %v565_v39 = vxor.u32 2147483648, %v548_v32  ;;  %v725_v26 = vld [vmem:[%s1835_s4] sm:$0xff] }
 0x11b   :  { %760 = vmatpush.msra.mxu3 %v725_v26 }
 0x11c   :  { %v562_v45 = vxor.u32 2147483648, %v556_v46  ;;  %v566_v47 = vsel %vm564_vm3, %v565_v39, %v556_v46 }
 0x11e   :  { %v563_v42 = vsel %vm561_vm2, %v548_v32, %v562_v45 }
 0x11f   :  { %v567_v3 = vsel %vm560_vm4, %v563_v42, %v566_v47 }
 0x120   :  { %v568_v38 = vsel %vm557_vm5, nan, %v567_v3  ;;  %v1056_v3 = vld [vmem:[%s1836_s5] ss:$0 sm:$0xff] }
 0x121   :  { %677 = vmatmul.f32.vlgmr.msra.gmra.mxu2 %v568_v38 }
 0x169   :  { %v638_v54 = vpop.f32.mrf.mxu0 }
 0x16a   :  { %v639_v57 = vadd.f32 %v1055_v51, %v638_v54 }
 0x17b   :  { %v658_v6 = vpop.f32.mrf.mxu1 }
 0x17c   :  { %v659_v5 = vadd.f32 %v658_v6, %v639_v57 }
 0x1a4   :  { %v678_v36 = vpop.f32.mrf.mxu2 }
 0x1a5   :  { %v1653_v29 = vadd.f32 %v678_v36, %v659_v5 }
 0x1a7   :  { %v682_v56 = vmul.f32 0.70710677, %v1653_v29  ;;  %v681_v45 = vmul.f32 0.5, %v1653_v29 }
 0x1a9   :  { %v683_v8 = vmul.f32 %v682_v56, %v682_v56 }
 0x1ab   :  { %v684_v63 = vmin.f32 %v683_v8, 16.0 }
 0x1ad   :  { %v685_v21 = vmul.f32 2.1237322e-06, %v684_v63  ;;  %v696_v62 = vmul.f32 3.8918573e-05, %v684_v63 }
 0x1af   :  { %v686_v10 = vadd.f32 0.00028619796, %v685_v21  ;;  %v697_v14 = vadd.f32 0.001143296, %v696_v62 }
 0x1b1   :  { %v687_v49 = vmul.f32 %v686_v10, %v684_v63  ;;  %v698_v55 = vmul.f32 %v697_v14, %v684_v63 }
 0x1b3   :  { %v699_v22 = vadd.f32 0.014752088, %v698_v55  ;;  %v688_v50 = vadd.f32 0.0036580483, %v687_v49  ;;  %v821_v49 = vld [vmem:[%s1837_s6 + $0x58] sm:$0xff] }
 0x1b5   :  { %v700_v0 = vmul.f32 %v699_v22, %v684_v63  ;;  %v689_v15 = vmul.f32 %v688_v50, %v684_v63  ;;  %v819_v22 = vld [vmem:[%s1837_s6 + $0x48] sm:$0xff] }
 0x1b7   :  { %v701_v25 = vadd.f32 0.112945676, %v700_v0  ;;  %v690_v4 = vadd.f32 0.05243302, %v689_v15  ;;  %v817_v0 = vld [vmem:[%s1837_s6 + $0x38] sm:$0xff] }
 0x1b9   :  { %v702_v61 = vmul.f32 %v701_v25, %v684_v63  ;;  %v691_v1 = vmul.f32 %v690_v4, %v684_v63 }
 0x1bb   :  { %v703_v7 = vadd.f32 0.4994258, %v702_v61  ;;  %v692_v37 = vadd.f32 0.18741608, %v691_v1 }
 0x1bd   :  { %v704_v17 = vmul.f32 %v703_v7, %v684_v63  ;;  %v693_v44 = vmul.f32 %v692_v37, %v684_v63  ;;  %v825_v63 = vld [vmem:[%s1837_s6 + $0x78] sm:$0xff] }
 0x1be   :  { %830 = vmatpush.msrb.mxu0 %v825_v63  ;;  %v813_v37 = vld [vmem:[%s1837_s6 + $0x18] sm:$0xff] }
 0x1bf   :  { %v705_v20 = vadd.f32 1.0, %v704_v17  ;;  %v694_v18 = vadd.f32 1.1283791, %v693_v44 }
 0x1c0   :  { %831 = vmatpush.msrb.mxu0 %v824_v2  ;;  %v907_v2 = vld [vmem:[#allocation2 + $0x60] sm:$0xff] }
 0x1c1   :  { %1060 = vrcp.f32 %v705_v20  ;;  %v717_v28 = vand.u32 2147483648, %v705_v20  ;;  %v715_v41 = vand.u32 2147483647, %v705_v20  ;;  %vm711_vm7 = vweird.f32 %v705_v20 }
 0x1c2   :  { %v695_v32 = vmul.f32 %v694_v18, %v682_v56  ;;  %832 = vmatpush.msrb.mxu0 %v823_v9  ;;  %v906_v9 = vld [vmem:[#allocation2 + $0x58] sm:$0xff] }
 0x1c3   :  { %v718_v31 = vor.u32 1.1754944e-38, %v717_v28  ;;  %vm716_vm9 = vcmp.eq.f32.partialorder %v715_v41, 8.507059e+37 }
 0x1c4   :  { %833 = vmatpush.msrb.mxu0 %v822_v12  ;;  %v905_v12 = vld [vmem:[#allocation2 + $0x50] sm:$0xff] }
 0x1c6   :  { %834 = vmatpush.msrb.mxu0 %v821_v49 }
 0x1c7   :  { %v1061_v48 = vpop.eup %1060 }
 0x1c8   :  { %v707_v27 = vmul.f32 %v1061_v48, %v705_v20  ;;  %vm712_vm6 = vweird.f32 %v1061_v48  ;;  %835 = vmatpush.msrb.mxu0 %v820_v19  ;;  %v814_v20 = vld [vmem:[%s1837_s6 + $0x20] sm:$0xff] }
 0x1c9   :  { %vm713_vm8 = vmor %vm711_vm7, %vm712_vm6 }
 0x1ca   :  { %v708_v16 = vsub.f32 1.0, %v707_v27  ;;  %836 = vmatpush.msrb.mxu0 %v819_v22 }
 0x1cc   :  { %v709_v53 = vmul.f32 %v1061_v48, %v708_v16  ;;  %837 = vmatpush.msrb.mxu0 %v818_v23  ;;  %v812_v16 = vld [vmem:[%s1837_s6 + $0x10] sm:$0xff] }
 0x1cd   :  { %v901_v23 = vld [vmem:[#allocation2 + $0x30] sm:$0xff] }
 0x1ce   :  { %v710_v30 = vadd.f32 %v1061_v48, %v709_v53  ;;  %838 = vmatpush.msrb.mxu0 %v817_v0  ;;  %v811_v53 = vld [vmem:[%s1837_s6 + $0x8] sm:$0xff] }
 0x1d0   :  { %v714_v11 = vsel %vm713_vm8, %v1061_v48, %v710_v30  ;;  %839 = vmatpush.msrb.mxu0 %v816_v52  ;;  %v810_v30 = vld [vmem:[%s1837_s6] sm:$0xff] }
 0x1d1   :  { %v719_v43 = vsel %vm716_vm9, %v718_v31, %v714_v11 }
 0x1d2   :  { %v720_v46 = vmul.f32 %v719_v43, %v695_v32  ;;  %840 = vmatpush.msrb.mxu0 %v815_v58  ;;  %v899_v58 = vld [vmem:[#allocation2 + $0x20] sm:$0xff] }
 0x1d4   :  { %v1035_v39 = vclamps-f32 %v720_v46, 1.0  ;;  %841 = vmatpush.msrb.mxu0 %v814_v20  ;;  %v1057_v46 = vld [vmem:[%s1838_s7] ss:$0 sm:$0xff] }
 0x1d6   :  { %v723_v42 = vadd.f32 1.0, %v1035_v39  ;;  %842 = vmatpush.msrb.mxu0 %v813_v37 }
 0x1d8   :  { %v1696_v47 = vmul.f32 %v723_v42, %v681_v45  ;;  %843 = vmatpush.msrb.mxu0 %v812_v16  ;;  %v895_v16 = vld [vmem:[#allocation2] sm:$0xff] }
 0x1da   :  { %761 = vmatmul.f32.vlgmr.msra.gmra.mxu3 %v1696_v47  ;;  %844 = vmatpush.msrb.mxu0 %v811_v53 }
 0x1dc   :  { %845 = vmatpush.msrb.mxu0 %v810_v30  ;;  %v1058_v30 = vld [vmem:[%s1840_s9] ss:$0 sm:$0xff] }
 0x25d   :  { %v762_v38 = vpop.f32.mrf.mxu3 }
 0x25e   :  { %v1702_v51 = vadd.f32 %v1056_v3, %v762_v38 }
 0x260   :  { %v766_v54 = vmul.f32 0.70710677, %v1702_v51  ;;  %v765_v31 = vmul.f32 0.5, %v1702_v51 }
 0x262   :  { %v767_v57 = vmul.f32 %v766_v54, %v766_v54 }
 0x264   :  { %v768_v35 = vmin.f32 %v767_v57, 16.0 }
 0x266   :  { %v769_v60 = vmul.f32 2.1237322e-06, %v768_v35  ;;  %v780_v6 = vmul.f32 3.8918573e-05, %v768_v35 }
 0x268   :  { %v770_v5 = vadd.f32 0.00028619796, %v769_v60  ;;  %v781_v59 = vadd.f32 0.001143296, %v780_v6 }
 0x26a   :  { %v771_v36 = vmul.f32 %v770_v5, %v768_v35  ;;  %v782_v29 = vmul.f32 %v781_v59, %v768_v35 }
 0x26c   :  { %v783_v34 = vadd.f32 0.014752088, %v782_v29  ;;  %v772_v56 = vadd.f32 0.0036580483, %v771_v36 }
 0x26e   :  { %v784_v33 = vmul.f32 %v783_v34, %v768_v35  ;;  %v773_v40 = vmul.f32 %v772_v56, %v768_v35  ;;  %v910_v34 = vld [vmem:[#allocation2 + $0x78] sm:$0xff]  ;;  %v909_v56 = vld [vmem:[#allocation2 + $0x70] sm:$0xff] }
 0x26f   :  { %915 = vmatpush.msrb.mxu1 %v910_v34 }
 0x270   :  { %v785_v8 = vadd.f32 0.112945676, %v784_v33  ;;  %v774_v10 = vadd.f32 0.05243302, %v773_v40 }
 0x271   :  { %916 = vmatpush.msrb.mxu1 %v909_v56  ;;  %v992_v56 = vld [vmem:[%s1841_s10 + $0x60] sm:$0xff] }
 0x272   :  { %v786_v21 = vmul.f32 %v785_v8, %v768_v35  ;;  %v775_v55 = vmul.f32 %v774_v10, %v768_v35  ;;  %v908_v8 = vld [vmem:[#allocation2 + $0x68] sm:$0xff] }
 0x273   :  { %917 = vmatpush.msrb.mxu1 %v908_v8  ;;  %v991_v8 = vld [vmem:[%s1841_s10 + $0x58] sm:$0xff] }
 0x274   :  { %v787_v62 = vadd.f32 0.4994258, %v786_v21  ;;  %v776_v50 = vadd.f32 0.18741608, %v775_v55  ;;  %v902_v55 = vld [vmem:[#allocation2 + $0x38] sm:$0xff] }
 0x275   :  { %918 = vmatpush.msrb.mxu1 %v907_v2  ;;  %v990_v2 = vld [vmem:[%s1841_s10 + $0x50] sm:$0xff] }
 0x276   :  { %v788_v14 = vmul.f32 %v787_v62, %v768_v35  ;;  %v777_v25 = vmul.f32 %v776_v50, %v768_v35 }
 0x277   :  { %919 = vmatpush.msrb.mxu1 %v906_v9 }
 0x278   :  { %v789_v13 = vadd.f32 1.0, %v788_v14  ;;  %v778_v4 = vadd.f32 1.1283791, %v777_v25  ;;  %v904_v14 = vld [vmem:[#allocation2 + $0x48] sm:$0xff] }
 0x279   :  { %920 = vmatpush.msrb.mxu1 %v905_v12 }
 0x27a   :  { %1062 = vrcp.f32 %v789_v13  ;;  %v801_v7 = vand.u32 2147483648, %v789_v13  ;;  %v799_v17 = vand.u32 2147483647, %v789_v13  ;;  %vm795_vm11 = vweird.f32 %v789_v13 }
 0x27b   :  { %v779_v44 = vmul.f32 %v778_v4, %v766_v54  ;;  %921 = vmatpush.msrb.mxu1 %v904_v14  ;;  %v898_v4 = vld [vmem:[#allocation2 + $0x18] sm:$0xff] }
 0x27c   :  { %v802_v48 = vor.u32 1.1754944e-38, %v801_v7  ;;  %vm800_vm13 = vcmp.eq.f32.partialorder %v799_v17, 8.507059e+37 }
 0x280   :  { %v1063_v24 = vpop.eup %1062 }
 0x281   :  { %v791_v15 = vmul.f32 %v1063_v24, %v789_v13  ;;  %vm796_vm10 = vweird.f32 %v1063_v24  ;;  %v903_v13 = vld [vmem:[#allocation2 + $0x40] sm:$0xff] }
 0x282   :  { %vm797_vm12 = vmor %vm795_vm11, %vm796_vm10  ;;  %922 = vmatpush.msrb.mxu1 %v903_v13  ;;  %v986_v13 = vld [vmem:[%s1841_s10 + $0x30] sm:$0xff] }
 0x283   :  { %v792_v61 = vsub.f32 1.0, %v791_v15 }
 0x284   :  { %923 = vmatpush.msrb.mxu1 %v902_v55 }
 0x285   :  { %v793_v26 = vmul.f32 %v1063_v24, %v792_v61 }
 0x286   :  { %924 = vmatpush.msrb.mxu1 %v901_v23 }
 0x287   :  { %v794_v1 = vadd.f32 %v1063_v24, %v793_v26 }
 0x289   :  { %v798_v27 = vsel %vm797_vm12, %v1063_v24, %v794_v1  ;;  %v900_v24 = vld [vmem:[#allocation2 + $0x28] sm:$0xff]  ;;  %v897_v1 = vld [vmem:[#allocation2 + $0x10] sm:$0xff] }
 0x28a   :  { %v803_v28 = vsel %vm800_vm13, %v802_v48, %v798_v27  ;;  %925 = vmatpush.msrb.mxu1 %v900_v24  ;;  %v984_v24 = vld [vmem:[%s1841_s10 + $0x20] sm:$0xff] }
 0x28b   :  { %v804_v18 = vmul.f32 %v803_v28, %v779_v44  ;;  %v896_v44 = vld [vmem:[#allocation2 + $0x8] sm:$0xff] }
 0x28c   :  { %926 = vmatpush.msrb.mxu1 %v899_v58 }
 0x28d   :  { %v1036_v41 = vclamps-f32 %v804_v18, 1.0 }
 0x28e   :  { %927 = vmatpush.msrb.mxu1 %v898_v4 }
 0x28f   :  { %v807_v32 = vadd.f32 1.0, %v1036_v41 }
 0x290   :  { %928 = vmatpush.msrb.mxu1 %v897_v1  ;;  %v980_v1 = vld [vmem:[%s1841_s10] sm:$0xff] }
 0x291   :  { %v808_v11 = vmul.f32 %v807_v32, %v765_v31 }
 0x292   :  { %929 = vmatpush.msrb.mxu1 %v896_v44 }
 0x293   :  { %v1755_v43 = vadd.f32 %v808_v11, %v1696_v47 }
 0x294   :  { %930 = vmatpush.msrb.mxu1 %v895_v16  ;;  %v1059_v16 = vld [vmem:[%s1842_s11] ss:$0 sm:$0xff] }
 0x295   :  { %846 = vmatmul.f32.vlgmr.msrb.gmra.mxu0 %v1755_v43 }
 0x312   :  { %v847_v39 = vpop.f32.mrf.mxu0 }
 0x313   :  { %v1761_v45 = vadd.f32 %v1057_v46, %v847_v39 }
 0x315   :  { %v851_v42 = vmul.f32 0.70710677, %v1761_v45  ;;  %v850_v28 = vmul.f32 0.5, %v1761_v45 }
 0x317   :  { %v852_v3 = vmul.f32 %v851_v42, %v851_v42 }
 0x319   :  { %v853_v38 = vmin.f32 %v852_v3, 16.0 }
 0x31b   :  { %v854_v51 = vmul.f32 2.1237322e-06, %v853_v38  ;;  %v865_v54 = vmul.f32 3.8918573e-05, %v853_v38 }
 0x31d   :  { %v855_v57 = vadd.f32 0.00028619796, %v854_v51  ;;  %v866_v35 = vadd.f32 0.001143296, %v865_v54 }
 0x31f   :  { %v856_v60 = vmul.f32 %v855_v57, %v853_v38  ;;  %v867_v47 = vmul.f32 %v866_v35, %v853_v38 }
 0x321   :  { %v868_v6 = vadd.f32 0.014752088, %v867_v47  ;;  %v857_v5 = vadd.f32 0.0036580483, %v856_v60 }
 0x323   :  { %v869_v59 = vmul.f32 %v868_v6, %v853_v38  ;;  %v858_v29 = vmul.f32 %v857_v5, %v853_v38  ;;  %v995_v6 = vld [vmem:[%s1841_s10 + $0x78] sm:$0xff]  ;;  %v994_v5 = vld [vmem:[%s1841_s10 + $0x70] sm:$0xff] }
 0x324   :  { %1000 = vmatpush.msrb.mxu2 %v995_v6 }
 0x325   :  { %v870_v36 = vadd.f32 0.112945676, %v869_v59  ;;  %v859_v63 = vadd.f32 0.05243302, %v858_v29 }
 0x326   :  { %1001 = vmatpush.msrb.mxu2 %v994_v5 }
 0x327   :  { %v871_v33 = vmul.f32 %v870_v36, %v853_v38  ;;  %v860_v10 = vmul.f32 %v859_v63, %v853_v38  ;;  %v993_v36 = vld [vmem:[%s1841_s10 + $0x68] sm:$0xff] }
 0x328   :  { %1002 = vmatpush.msrb.mxu2 %v993_v36 }
 0x329   :  { %v872_v40 = vadd.f32 0.4994258, %v871_v33  ;;  %v861_v49 = vadd.f32 0.18741608, %v860_v10  ;;  %v987_v10 = vld [vmem:[%s1841_s10 + $0x38] sm:$0xff] }
 0x32a   :  { %1003 = vmatpush.msrb.mxu2 %v992_v56 }
 0x32b   :  { %v873_v21 = vmul.f32 %v872_v40, %v853_v38  ;;  %v862_v22 = vmul.f32 %v861_v49, %v853_v38 }
 0x32c   :  { %1004 = vmatpush.msrb.mxu2 %v991_v8 }
 0x32d   :  { %v874_v62 = vadd.f32 1.0, %v873_v21  ;;  %v863_v15 = vadd.f32 1.1283791, %v862_v22  ;;  %v989_v21 = vld [vmem:[%s1841_s10 + $0x48] sm:$0xff] }
 0x32e   :  { %1005 = vmatpush.msrb.mxu2 %v990_v2 }
 0x32f   :  { %1064 = vrcp.f32 %v874_v62  ;;  %v886_v25 = vand.u32 2147483648, %v874_v62  ;;  %v884_v61 = vand.u32 2147483647, %v874_v62  ;;  %vm880_vm15 = vweird.f32 %v874_v62 }
 0x330   :  { %v864_v17 = vmul.f32 %v863_v15, %v851_v42  ;;  %1006 = vmatpush.msrb.mxu2 %v989_v21  ;;  %v983_v15 = vld [vmem:[%s1841_s10 + $0x18] sm:$0xff] }
 0x331   :  { %v887_v26 = vor.u32 1.1754944e-38, %v886_v25  ;;  %vm885_vm1 = vcmp.eq.f32.partialorder %v884_v61, 8.507059e+37 }
 0x335   :  { %v1065_v19 = vpop.eup %1064 }
 0x336   :  { %v876_v50 = vmul.f32 %v1065_v19, %v874_v62  ;;  %vm881_vm14 = vweird.f32 %v1065_v19  ;;  %v988_v62 = vld [vmem:[%s1841_s10 + $0x40] sm:$0xff] }
 0x337   :  { %vm882_vm0 = vmor %vm880_vm15, %vm881_vm14  ;;  %1007 = vmatpush.msrb.mxu2 %v988_v62 }
 0x338   :  { %v877_v0 = vsub.f32 1.0, %v876_v50 }
 0x339   :  { %1008 = vmatpush.msrb.mxu2 %v987_v10 }
 0x33a   :  { %v878_v52 = vmul.f32 %v1065_v19, %v877_v0 }
 0x33b   :  { %1009 = vmatpush.msrb.mxu2 %v986_v13 }
 0x33c   :  { %v879_v7 = vadd.f32 %v1065_v19, %v878_v52 }
 0x33e   :  { %v883_v20 = vsel %vm882_vm0, %v1065_v19, %v879_v7  ;;  %v985_v19 = vld [vmem:[%s1841_s10 + $0x28] sm:$0xff]  ;;  %v982_v7 = vld [vmem:[%s1841_s10 + $0x10] sm:$0xff] }
 0x33f   :  { %v888_v37 = vsel %vm885_vm1, %v887_v26, %v883_v20  ;;  %1010 = vmatpush.msrb.mxu2 %v985_v19 }
 0x340   :  { %v889_v48 = vmul.f32 %v888_v37, %v864_v17  ;;  %v981_v17 = vld [vmem:[%s1841_s10 + $0x8] sm:$0xff] }
 0x341   :  { %1011 = vmatpush.msrb.mxu2 %v984_v24 }
 0x342   :  { %v1037_v27 = vclamps-f32 %v889_v48, 1.0 }
 0x343   :  { %1012 = vmatpush.msrb.mxu2 %v983_v15 }
 0x344   :  { %v892_v18 = vadd.f32 1.0, %v1037_v27 }
 0x345   :  { %1013 = vmatpush.msrb.mxu2 %v982_v7 }
 0x346   :  { %v893_v53 = vmul.f32 %v892_v18, %v850_v28 }
 0x347   :  { %1014 = vmatpush.msrb.mxu2 %v981_v17 }
 0x348   :  { %v1766_v41 = vadd.f32 %v893_v53, %v1755_v43 }
 0x349   :  { %1015 = vmatpush.msrb.mxu2 %v980_v1 }
 0x34a   :  { %931 = vmatmul.f32.vlgmr.msrb.gmra.mxu1 %v1766_v41 }
 0x3c7   :  { %v932_v31 = vpop.f32.mrf.mxu1 }
 0x3c8   :  { %v1772_v32 = vadd.f32 %v1058_v30, %v932_v31 }
 0x3ca   :  { %v936_v11 = vmul.f32 0.70710677, %v1772_v32  ;;  %v935_v37 = vmul.f32 0.5, %v1772_v32 }
 0x3cc   :  { %v937_v46 = vmul.f32 %v936_v11, %v936_v11 }
 0x3ce   :  { %v938_v39 = vmin.f32 %v937_v46, 16.0 }
 0x3d0   :  { %v939_v45 = vmul.f32 2.1237322e-06, %v938_v39  ;;  %v950_v42 = vmul.f32 3.8918573e-05, %v938_v39 }
 0x3d2   :  { %v940_v3 = vadd.f32 0.00028619796, %v939_v45  ;;  %v951_v38 = vadd.f32 0.001143296, %v950_v42 }
 0x3d4   :  { %v941_v51 = vmul.f32 %v940_v3, %v938_v39  ;;  %v952_v43 = vmul.f32 %v951_v38, %v938_v39 }
 0x3d6   :  { %v953_v54 = vadd.f32 0.014752088, %v952_v43  ;;  %v942_v57 = vadd.f32 0.0036580483, %v941_v51 }
 0x3d8   :  { %v954_v35 = vmul.f32 %v953_v54, %v938_v39  ;;  %v943_v47 = vmul.f32 %v942_v57, %v938_v39 }
 0x3da   :  { %v955_v60 = vadd.f32 0.112945676, %v954_v35  ;;  %v944_v34 = vadd.f32 0.05243302, %v943_v47 }
 0x3dc   :  { %v956_v59 = vmul.f32 %v955_v60, %v938_v39  ;;  %v945_v63 = vmul.f32 %v944_v34, %v938_v39 }
 0x3de   :  { %v957_v29 = vadd.f32 0.4994258, %v956_v59  ;;  %v946_v9 = vadd.f32 0.18741608, %v945_v63 }
 0x3e0   :  { %v958_v33 = vmul.f32 %v957_v29, %v938_v39  ;;  %v947_v14 = vmul.f32 %v946_v9, %v938_v39 }
 0x3e2   :  { %v959_v40 = vadd.f32 1.0, %v958_v33  ;;  %v948_v50 = vadd.f32 1.1283791, %v947_v14 }
 0x3e4   :  { %1066 = vrcp.f32 %v959_v40  ;;  %v971_v22 = vand.u32 2147483648, %v959_v40  ;;  %v969_v0 = vand.u32 2147483647, %v959_v40  ;;  %vm965_vm3 = vweird.f32 %v959_v40 }
 0x3e5   :  { %v949_v61 = vmul.f32 %v948_v50, %v936_v11 }
 0x3e6   :  { %v972_v52 = vor.u32 1.1754944e-38, %v971_v22  ;;  %vm970_vm5 = vcmp.eq.f32.partialorder %v969_v0, 8.507059e+37 }
 0x3ea   :  { %v1067_v12 = vpop.eup %1066 }
 0x3eb   :  { %v961_v49 = vmul.f32 %v1067_v12, %v959_v40  ;;  %vm966_vm2 = vweird.f32 %v1067_v12 }
 0x3ec   :  { %vm967_vm4 = vmor %vm965_vm3, %vm966_vm2 }
 0x3ed   :  { %v962_v55 = vsub.f32 1.0, %v961_v49 }
 0x3ef   :  { %v963_v23 = vmul.f32 %v1067_v12, %v962_v55 }
 0x3f1   :  { %v964_v25 = vadd.f32 %v1067_v12, %v963_v23 }
 0x3f3   :  { %v968_v58 = vsel %vm967_vm4, %v1067_v12, %v964_v25 }
 0x3f4   :  { %v973_v4 = vsel %vm970_vm5, %v972_v52, %v968_v58 }
 0x3f5   :  { %v974_v26 = vmul.f32 %v973_v4, %v949_v61 }
 0x3f7   :  { %v1038_v20 = vclamps-f32 %v974_v26, 1.0 }
 0x3f9   :  { %v977_v48 = vadd.f32 1.0, %v1038_v20 }
 0x3fb   :  { %v978_v44 = vmul.f32 %v977_v48, %v935_v37 }
 0x3fd   :  { %v979_v27 = vadd.f32 %v978_v44, %v1766_v41 }
 0x3ff   :  { %1016 = vmatmul.f32.vlgmr.msrb.gmra.mxu2 %v979_v27 }
 0x482   :  { %v1017_v28 = vpop.f32.mrf.mxu2 }
 0x483   :  { %v1018_v18 = vadd.f32 %v1059_v16, %v1017_v28 }
 0x485   :  { %1020 = vst [vmem:[%s1843_s12] sm:$0xff] %v1018_v18 }
 0x486   :  { %1025 = vsyncpa [#allocation3], 1 }

</bundles_post_ra>
